<compile_context>
chip_gen: v7x
topology: tpu7x:2x2x1
jax: 0.10.0
libtpu: 0.0.40
codegen_flags: <defaults>
</compile_context>

<pallas_src>
import math

import jax
import jax.numpy as jnp
from jax import lax
from jax.experimental import pallas as pl
from jax.experimental.pallas import tpu as pltpu


def _mha_kernel(x_ref, wq_ref, bq_ref, wk_ref, bk_ref, wv_ref, bv_ref,
                wo_ref, bo_ref, o_ref):
    """Whole-sequence MHA for one batch element.

    Block shapes:
      x_ref            : (1, S, D)      activations (MXU dtype)
      wq/wk/wv_ref     : (H, D, d_k)    per-head projection columns (MXU dtype)
      bq/bk/bv_ref     : (H, d_k, 1)    f32 biases (scale folded into bq/wq)
      wo_ref           : (H, d_k, D)    per-head output-projection rows
      bo_ref           : (1, D)         f32
      o_ref            : (1, S, D)
    """
    x = x_ref[0]                       # (S, D)
    cdt = x.dtype                      # MXU operand dtype (f32 or bf16)

    def project(w_ref, b_ref):
        # (H, D, d_k) x (S, D) --contract D--> (H, d_k, S), f32 accumulation.
        y = lax.dot_general(w_ref[...], x, (((1,), (1,)), ((), ())),
                            preferred_element_type=jnp.float32)
        return y + b_ref[...]          # (H, d_k, 1) broadcasts over S

    q = project(wq_ref, bq_ref)        # 1/sqrt(d_k) already folded into Wq, bq
    k = project(wk_ref, bk_ref)
    v = project(wv_ref, bv_ref)

    # All-head scores in one batched MXU contraction:
    # (H, d_k, Sq) x (H, d_k, Sk) --batch H, contract d_k--> (H, Sq, Sk)
    s = lax.dot_general(q.astype(cdt), k.astype(cdt),
                        (((1,), (1,)), ((0,), (0,))),
                        preferred_element_type=jnp.float32)

    # Numerically-stable softmax over keys (minor dim); denominator on the EUP.
    s = s - jnp.max(s, axis=-1, keepdims=True)
    p = jnp.exp(s)
    p = p * pl.reciprocal(jnp.sum(p, axis=-1, keepdims=True), approx=True)

    # (H, Sq, Sk) x (H, d_k, Sk) --batch H, contract Sk--> (H, Sq, d_k)
    attn = lax.dot_general(p.astype(cdt), v.astype(cdt),
                           (((2,), (2,)), ((0,), (0,))),
                           preferred_element_type=jnp.float32)

    # Output projection, head-batched, then reduce over heads:
    # (H, Sq, d_k) x (H, d_k, D) -> (H, Sq, D);  sum_h == concat(heads) @ W_o
    per_head = lax.dot_general(attn.astype(cdt), wo_ref[...],
                               (((2,), (1,)), ((0,), (0,))),
                               preferred_element_type=jnp.float32)
    out = jnp.sum(per_head, axis=0) + bo_ref[...]        # (Sq, D)
    o_ref[0] = out.astype(o_ref.dtype)


def _prep_params(params, num_heads, d_model, mxu_dtype):
    """Reshape/scale weights once in the wrapper so the kernel needs no
    per-head slicing: W_q/W_k/W_v -> (H, D, d_k), W_o -> (H, d_k, D)."""
    D, H = d_model, num_heads
    dk = D // H
    scale = 1.0 / math.sqrt(dk)

    def head_cols(w):  # (D, D) -> (H, D, d_k) contiguous per-head column blocks
        return w.reshape(D, H, dk).transpose(1, 0, 2)

    wq = (head_cols(params["wq"]) * scale).astype(mxu_dtype)
    wk = head_cols(params["wk"]).astype(mxu_dtype)
    wv = head_cols(params["wv"]).astype(mxu_dtype)
    wo = params["wo"].reshape(H, dk, D).astype(mxu_dtype)

    bq = (params["bq"].reshape(H, dk, 1) * scale).astype(jnp.float32)
    bk = params["bk"].reshape(H, dk, 1).astype(jnp.float32)
    bv = params["bv"].reshape(H, dk, 1).astype(jnp.float32)
    bo = params["bo"].reshape(1, D).astype(jnp.float32)
    return wq, bq, wk, bk, wv, bv, wo, bo


def _vmem_limit_bytes(S, D, H, dk, mxu_itemsize):
    f32 = 4
    act = 2 * S * D * (mxu_itemsize + f32)                 # x in / out, 2-buffered
    weights = 2 * (3 * H * D * dk + H * dk * D) * mxu_itemsize
    biases = 2 * (3 * H * dk + D) * f32
    inter = (3 * H * dk * S + 2 * H * S * S + H * S * dk + H * S * D + S * D) * f32
    est = act + weights + biases + inter
    # Generous headroom, but never above ~48 MiB (v7x has 64 MiB physical VMEM).
    return int(min(max(4 * est, 16 << 20), 48 << 20))


def mha_forward(x, params, num_heads, mxu_dtype=jnp.float32):
    """x: (B, S, D) float32; params: dict of wq,bq,wk,bk,wv,bv,wo,bo."""
    B, S, D = x.shape
    H = num_heads
    assert D % H == 0, "d_model must be divisible by num_heads"
    dk = D // H

    weights = _prep_params(params, H, D, mxu_dtype)
    xm = x.astype(mxu_dtype)
    vmem_limit = _vmem_limit_bytes(S, D, H, dk, jnp.dtype(mxu_dtype).itemsize)

    def build(single_buffer_weights):
        def const_spec(shape):
            ndim = len(shape)
            index_map = lambda b, _n=ndim: (0,) * _n
            if single_buffer_weights:
                # Grid-invariant operands: no point double-buffering them.
                return pl.BlockSpec(shape, index_map, pipeline_mode=pl.Buffered(1))
            return pl.BlockSpec(shape, index_map)

        in_specs = [
            pl.BlockSpec((1, S, D), lambda b: (b, 0, 0)),        # x
            const_spec((H, D, dk)), const_spec((H, dk, 1)),      # W_q, b_q
            const_spec((H, D, dk)), const_spec((H, dk, 1)),      # W_k, b_k
            const_spec((H, D, dk)), const_spec((H, dk, 1)),      # W_v, b_v
            const_spec((H, dk, D)), const_spec((1, D)),          # W_o, b_o
        ]
        return pl.pallas_call(
            _mha_kernel,
            out_shape=jax.ShapeDtypeStruct((B, S, D), x.dtype),
            grid_spec=pltpu.PrefetchScalarGridSpec(
                num_scalar_prefetch=0,
                grid=(B,),
                in_specs=in_specs,
                out_specs=pl.BlockSpec((1, S, D), lambda b: (b, 0, 0)),
            ),
            compiler_params=pltpu.CompilerParams(
                dimension_semantics=("parallel",),
                vmem_limit_bytes=vmem_limit,
            ),
        )

    try:
        return build(single_buffer_weights=True)(xm, *weights)
    except Exception:
        # pipeline_mode=pl.Buffered(1) not supported by this JAX build /
        # lowering; fall back to default (double-buffered) weight pipelining.
        return build(single_buffer_weights=False)(xm, *weights)


def mha_reference(x, params, num_heads):
    """Pure-JAX reference matching the PyTorch module semantics."""
    B, S, D = x.shape
    d_k = D // num_heads
    q = x @ params["wq"] + params["bq"]
    k = x @ params["wk"] + params["bk"]
    v = x @ params["wv"] + params["bv"]
    q = q.reshape(B, S, num_heads, d_k).transpose(0, 2, 1, 3)
    k = k.reshape(B, S, num_heads, d_k).transpose(0, 2, 1, 3)
    v = v.reshape(B, S, num_heads, d_k).transpose(0, 2, 1, 3)
    scores = jnp.einsum("bhsd,bhtd->bhst", q, k) / math.sqrt(d_k)
    weights = jax.nn.softmax(scores, axis=-1)
    out = jnp.einsum("bhst,bhtd->bhsd", weights, v)
    out = out.transpose(0, 2, 1, 3).reshape(B, S, D)
    return out @ params["wo"] + params["bo"]


if __name__ == "__main__":
    B, S, D, H = 2, 8, 32, 4

    key = jax.random.PRNGKey(0)
    keys = jax.random.split(key, 9)
    scale = 1.0 / math.sqrt(D)
    params = {
        "wq": jax.random.normal(keys[0], (D, D), jnp.float32) * scale,
        "bq": jax.random.normal(keys[1], (D,), jnp.float32) * 0.1,
        "wk": jax.random.normal(keys[2], (D, D), jnp.float32) * scale,
        "bk": jax.random.normal(keys[3], (D,), jnp.float32) * 0.1,
        "wv": jax.random.normal(keys[4], (D, D), jnp.float32) * scale,
        "bv": jax.random.normal(keys[5], (D,), jnp.float32) * 0.1,
        "wo": jax.random.normal(keys[6], (D, D), jnp.float32) * scale,
        "bo": jax.random.normal(keys[7], (D,), jnp.float32) * 0.1,
    }
    x = jax.random.normal(keys[8], (B, S, D), jnp.float32)

    ref = mha_reference(x, params, H)

    # f32 MXU-operand path (tolerance loosened slightly for the EUP approximate
    # reciprocal in the softmax denominator).
    out_f32 = jax.block_until_ready(mha_forward(x, params, H))
    assert out_f32.shape == (B, S, D)
    err_f32 = jnp.max(jnp.abs(out_f32 - ref))
    assert jnp.allclose(out_f32, ref, atol=1e-2, rtol=1e-2), (
        f"f32 path max abs err {err_f32}")

    # bf16 MXU-operand path (softmax/accumulation stay f32); loose tolerance.
    out_bf16 = jax.block_until_ready(
        mha_forward(x, params, H, mxu_dtype=jnp.bfloat16))
    assert out_bf16.shape == (B, S, D)
    assert out_bf16.dtype == x.dtype
    err_bf16 = jnp.max(jnp.abs(out_bf16 - ref))
    assert jnp.allclose(out_bf16, ref, atol=1e-1, rtol=1e-1), (
        f"bf16 path max abs err {err_bf16}")

    print("KERNEL_OK")
</pallas_src>

<mosaic_0001>
module attributes {stable_mosaic.version = 11 : i64} {
  func.func @_mha_kernel(%arg0: i32, %arg1: memref<1x8x32xf32, #tpu.memory_space<vmem>>, %arg2: memref<4x32x8xf32, #tpu.memory_space<vmem>>, %arg3: memref<4x8x1xf32, #tpu.memory_space<vmem>>, %arg4: memref<4x32x8xf32, #tpu.memory_space<vmem>>, %arg5: memref<4x8x1xf32, #tpu.memory_space<vmem>>, %arg6: memref<4x32x8xf32, #tpu.memory_space<vmem>>, %arg7: memref<4x8x1xf32, #tpu.memory_space<vmem>>, %arg8: memref<4x8x32xf32, #tpu.memory_space<vmem>>, %arg9: memref<1x32xf32, #tpu.memory_space<vmem>>, %arg10: memref<1x8x32xf32, #tpu.memory_space<vmem>>) attributes {dimension_semantics = [#tpu.dimension_semantics<parallel>], iteration_bounds = array<i64: 2>, scalar_prefetch = 0 : i64, scratch_operands = 0 : i64, tpu.core_type = #tpu.core_type<tc>, window_params = [{transform_indices = @transform_0, window_bounds = array<i64: 1, 8, 32>}, {pipeline_mode = #tpu.pipeline_mode<synchronous>, transform_indices = @transform_1, window_bounds = array<i64: 4, 32, 8>}, {pipeline_mode = #tpu.pipeline_mode<synchronous>, transform_indices = @transform_2, window_bounds = array<i64: 4, 8, 1>}, {pipeline_mode = #tpu.pipeline_mode<synchronous>, transform_indices = @transform_3, window_bounds = array<i64: 4, 32, 8>}, {pipeline_mode = #tpu.pipeline_mode<synchronous>, transform_indices = @transform_4, window_bounds = array<i64: 4, 8, 1>}, {pipeline_mode = #tpu.pipeline_mode<synchronous>, transform_indices = @transform_5, window_bounds = array<i64: 4, 32, 8>}, {pipeline_mode = #tpu.pipeline_mode<synchronous>, transform_indices = @transform_6, window_bounds = array<i64: 4, 8, 1>}, {pipeline_mode = #tpu.pipeline_mode<synchronous>, transform_indices = @transform_7, window_bounds = array<i64: 4, 8, 32>}, {pipeline_mode = #tpu.pipeline_mode<synchronous>, transform_indices = @transform_8, window_bounds = array<i64: 1, 32>}, {transform_indices = @transform_9, window_bounds = array<i64: 1, 8, 32>}]} {
    %c0 = arith.constant 0 : index
    %c0_0 = arith.constant 0 : index
    %c0_1 = arith.constant 0 : index
    %0 = vector.load %arg1[%c0, %c0_0, %c0_1] : memref<1x8x32xf32, #tpu.memory_space<vmem>>, vector<1x8x32xf32>
    %1 = vector.shape_cast %0 : vector<1x8x32xf32> to vector<8x32xf32>
    %c0_2 = arith.constant 0 : index
    %c0_3 = arith.constant 0 : index
    %c0_4 = arith.constant 0 : index
    %2 = vector.load %arg2[%c0_2, %c0_3, %c0_4] : memref<4x32x8xf32, #tpu.memory_space<vmem>>, vector<4x32x8xf32>
    %cst = arith.constant dense<0.000000e+00> : vector<4x8x8xf32>
    %3 = tpu.matmul %2, %1, %cst {dimension_numbers = #tpu.dot_dimension_numbers<[1], [1], [0, 2], [0], [0, 0, 0, 2, 1, 0], [], []>} : vector<4x32x8xf32>, vector<8x32xf32>, vector<4x8x8xf32> -> vector<4x8x8xf32>
    %c0_5 = arith.constant 0 : index
    %c0_6 = arith.constant 0 : index
    %c0_7 = arith.constant 0 : index
    %4 = vector.load %arg3[%c0_5, %c0_6, %c0_7] : memref<4x8x1xf32, #tpu.memory_space<vmem>>, vector<4x8x1xf32>
    %5 = vector.broadcast %4 : vector<4x8x1xf32> to vector<4x8x8xf32>
    %6 = arith.addf %3, %5 : vector<4x8x8xf32>
    %c0_8 = arith.constant 0 : index
    %c0_9 = arith.constant 0 : index
    %c0_10 = arith.constant 0 : index
    %7 = vector.load %arg4[%c0_8, %c0_9, %c0_10] : memref<4x32x8xf32, #tpu.memory_space<vmem>>, vector<4x32x8xf32>
    %cst_11 = arith.constant dense<0.000000e+00> : vector<4x8x8xf32>
    %8 = tpu.matmul %7, %1, %cst_11 {dimension_numbers = #tpu.dot_dimension_numbers<[1], [1], [0, 2], [0], [0, 0, 0, 2, 1, 0], [], []>} : vector<4x32x8xf32>, vector<8x32xf32>, vector<4x8x8xf32> -> vector<4x8x8xf32>
    %c0_12 = arith.constant 0 : index
    %c0_13 = arith.constant 0 : index
    %c0_14 = arith.constant 0 : index
    %9 = vector.load %arg5[%c0_12, %c0_13, %c0_14] : memref<4x8x1xf32, #tpu.memory_space<vmem>>, vector<4x8x1xf32>
    %10 = vector.broadcast %9 : vector<4x8x1xf32> to vector<4x8x8xf32>
    %11 = arith.addf %8, %10 : vector<4x8x8xf32>
    %c0_15 = arith.constant 0 : index
    %c0_16 = arith.constant 0 : index
    %c0_17 = arith.constant 0 : index
    %12 = vector.load %arg6[%c0_15, %c0_16, %c0_17] : memref<4x32x8xf32, #tpu.memory_space<vmem>>, vector<4x32x8xf32>
    %cst_18 = arith.constant dense<0.000000e+00> : vector<4x8x8xf32>
    %13 = tpu.matmul %12, %1, %cst_18 {dimension_numbers = #tpu.dot_dimension_numbers<[1], [1], [0, 2], [0], [0, 0, 0, 2, 1, 0], [], []>} : vector<4x32x8xf32>, vector<8x32xf32>, vector<4x8x8xf32> -> vector<4x8x8xf32>
    %c0_19 = arith.constant 0 : index
    %c0_20 = arith.constant 0 : index
    %c0_21 = arith.constant 0 : index
    %14 = vector.load %arg7[%c0_19, %c0_20, %c0_21] : memref<4x8x1xf32, #tpu.memory_space<vmem>>, vector<4x8x1xf32>
    %15 = vector.broadcast %14 : vector<4x8x1xf32> to vector<4x8x8xf32>
    %16 = arith.addf %13, %15 : vector<4x8x8xf32>
    %cst_22 = arith.constant dense<0.000000e+00> : vector<4x8x8xf32>
    %17 = tpu.matmul %6, %11, %cst_22 {dimension_numbers = #tpu.dot_dimension_numbers<[1], [1], [2], [2], [0, 0, 0, 2, 1, 2], [0], [0]>} : vector<4x8x8xf32>, vector<4x8x8xf32>, vector<4x8x8xf32> -> vector<4x8x8xf32>
    %cst_23 = arith.constant dense<0xFF800000> : vector<4x8xf32>
    %18 = vector.multi_reduction <maximumf>, %17, %cst_23 [2] : vector<4x8x8xf32> to vector<4x8xf32>
    %19 = vector.shape_cast %18 : vector<4x8xf32> to vector<4x8x1xf32>
    %20 = vector.broadcast %19 : vector<4x8x1xf32> to vector<4x8x8xf32>
    %21 = arith.subf %17, %20 : vector<4x8x8xf32>
    %22 = math.exp %21 : vector<4x8x8xf32>
    %cst_24 = arith.constant dense<0.000000e+00> : vector<4x8xf32>
    %23 = vector.multi_reduction <add>, %22, %cst_24 [2] : vector<4x8x8xf32> to vector<4x8xf32>
    %24 = vector.shape_cast %23 : vector<4x8xf32> to vector<4x8x1xf32>
    %25 = tpu.reciprocal %24 {approx = true} : vector<4x8x1xf32> -> vector<4x8x1xf32>
    %26 = vector.broadcast %25 : vector<4x8x1xf32> to vector<4x8x8xf32>
    %27 = arith.mulf %22, %26 : vector<4x8x8xf32>
    %cst_25 = arith.constant dense<0.000000e+00> : vector<4x8x8xf32>
    %28 = tpu.matmul %27, %16, %cst_25 {dimension_numbers = #tpu.dot_dimension_numbers<[2], [2], [1], [1], [0, 0, 0, 1, 1, 1], [0], [0]>} : vector<4x8x8xf32>, vector<4x8x8xf32>, vector<4x8x8xf32> -> vector<4x8x8xf32>
    %c0_26 = arith.constant 0 : index
    %c0_27 = arith.constant 0 : index
    %c0_28 = arith.constant 0 : index
    %29 = vector.load %arg8[%c0_26, %c0_27, %c0_28] : memref<4x8x32xf32, #tpu.memory_space<vmem>>, vector<4x8x32xf32>
    %cst_29 = arith.constant dense<0.000000e+00> : vector<4x8x32xf32>
    %30 = tpu.matmul %28, %29, %cst_29 {dimension_numbers = #tpu.dot_dimension_numbers<[2], [1], [1], [2], [0, 0, 0, 1, 1, 2], [0], [0]>} : vector<4x8x8xf32>, vector<4x8x32xf32>, vector<4x8x32xf32> -> vector<4x8x32xf32>
    %cst_30 = arith.constant dense<0.000000e+00> : vector<8x32xf32>
    %31 = vector.multi_reduction <add>, %30, %cst_30 [0] : vector<4x8x32xf32> to vector<8x32xf32>
    %c0_31 = arith.constant 0 : index
    %c0_32 = arith.constant 0 : index
    %32 = vector.load %arg9[%c0_31, %c0_32] : memref<1x32xf32, #tpu.memory_space<vmem>>, vector<1x32xf32>
    %33 = vector.broadcast %32 : vector<1x32xf32> to vector<8x32xf32>
    %34 = arith.addf %31, %33 : vector<8x32xf32>
    %c0_33 = arith.constant 0 : index
    %c0_34 = arith.constant 0 : index
    %c0_35 = arith.constant 0 : index
    %35 = vector.load %arg10[%c0_33, %c0_34, %c0_35] : memref<1x8x32xf32, #tpu.memory_space<vmem>>, vector<1x8x32xf32>
    %36 = vector.shape_cast %35 : vector<1x8x32xf32> to vector<8x32xf32>
    %37 = vector.shape_cast %34 : vector<8x32xf32> to vector<1x8x32xf32>
    tpu.vector_store %arg10[%c0_33, %c0_34, %c0_35], %37 {strides = array<i32>} : memref<1x8x32xf32, #tpu.memory_space<vmem>>, vector<1x8x32xf32>,
    return
  }
  func.func @transform_0(%arg0: i32) -> (i32, i32, i32) {
    %c0_i32 = arith.constant 0 : i32
    %c0_i32_0 = arith.constant 0 : i32
    %c0_i32_1 = arith.constant 0 : i32
    return %arg0, %c0_i32, %c0_i32_0 : i32, i32, i32
  }
  func.func @transform_1(%arg0: i32) -> (i32, i32, i32) {
    %c0_i32 = arith.constant 0 : i32
    %c0_i32_0 = arith.constant 0 : i32
    %c0_i32_1 = arith.constant 0 : i32
    %c0_i32_2 = arith.constant 0 : i32
    return %c0_i32, %c0_i32_0, %c0_i32_1 : i32, i32, i32
  }
  func.func @transform_2(%arg0: i32) -> (i32, i32, i32) {
    %c0_i32 = arith.constant 0 : i32
    %c0_i32_0 = arith.constant 0 : i32
    %c0_i32_1 = arith.constant 0 : i32
    %c0_i32_2 = arith.constant 0 : i32
    return %c0_i32, %c0_i32_0, %c0_i32_1 : i32, i32, i32
  }
  func.func @transform_3(%arg0: i32) -> (i32, i32, i32) {
    %c0_i32 = arith.constant 0 : i32
    %c0_i32_0 = arith.constant 0 : i32
    %c0_i32_1 = arith.constant 0 : i32
    %c0_i32_2 = arith.constant 0 : i32
    return %c0_i32, %c0_i32_0, %c0_i32_1 : i32, i32, i32
  }
  func.func @transform_4(%arg0: i32) -> (i32, i32, i32) {
    %c0_i32 = arith.constant 0 : i32
    %c0_i32_0 = arith.constant 0 : i32
    %c0_i32_1 = arith.constant 0 : i32
    %c0_i32_2 = arith.constant 0 : i32
    return %c0_i32, %c0_i32_0, %c0_i32_1 : i32, i32, i32
  }
  func.func @transform_5(%arg0: i32) -> (i32, i32, i32) {
    %c0_i32 = arith.constant 0 : i32
    %c0_i32_0 = arith.constant 0 : i32
    %c0_i32_1 = arith.constant 0 : i32
    %c0_i32_2 = arith.constant 0 : i32
    return %c0_i32, %c0_i32_0, %c0_i32_1 : i32, i32, i32
  }
  func.func @transform_6(%arg0: i32) -> (i32, i32, i32) {
    %c0_i32 = arith.constant 0 : i32
    %c0_i32_0 = arith.constant 0 : i32
    %c0_i32_1 = arith.constant 0 : i32
    %c0_i32_2 = arith.constant 0 : i32
    return %c0_i32, %c0_i32_0, %c0_i32_1 : i32, i32, i32
  }
  func.func @transform_7(%arg0: i32) -> (i32, i32, i32) {
    %c0_i32 = arith.constant 0 : i32
    %c0_i32_0 = arith.constant 0 : i32
    %c0_i32_1 = arith.constant 0 : i32
    %c0_i32_2 = arith.constant 0 : i32
    return %c0_i32, %c0_i32_0, %c0_i32_1 : i32, i32, i32
  }
  func.func @transform_8(%arg0: i32) -> (i32, i32) {
    %c0_i32 = arith.constant 0 : i32
    %c0_i32_0 = arith.constant 0 : i32
    %c0_i32_1 = arith.constant 0 : i32
    return %c0_i32, %c0_i32_0 : i32, i32
  }
  func.func @transform_9(%arg0: i32) -> (i32, i32, i32) {
    %c0_i32 = arith.constant 0 : i32
    %c0_i32_0 = arith.constant 0 : i32
    %c0_i32_1 = arith.constant 0 : i32
    return %arg0, %c0_i32, %c0_i32_0 : i32, i32, i32
  }
}

module attributes {stable_mosaic.version = 11 : i64} {
  func.func @_mha_kernel(%arg0: i32, %arg1: memref<1x8x32xf32, #tpu.memory_space<vmem>>, %arg2: memref<4x32x8xf32, #tpu.memory_space<vmem>>, %arg3: memref<4x8x1xf32, #tpu.memory_space<vmem>>, %arg4: memref<4x32x8xf32, #tpu.memory_space<vmem>>, %arg5: memref<4x8x1xf32, #tpu.memory_space<vmem>>, %arg6: memref<4x32x8xf32, #tpu.memory_space<vmem>>, %arg7: memref<4x8x1xf32, #tpu.memory_space<vmem>>, %arg8: memref<4x8x32xf32, #tpu.memory_space<vmem>>, %arg9: memref<1x32xf32, #tpu.memory_space<vmem>>, %arg10: memref<1x8x32xf32, #tpu.memory_space<vmem>>) attributes {dimension_semantics = [#tpu.dimension_semantics<parallel>], iteration_bounds = array<i64: 2>, scalar_prefetch = 0 : i64, scratch_operands = 0 : i64, tpu.core_type = #tpu.core_type<tc>, window_params = [{transform_indices = @transform_0, window_bounds = array<i64: 1, 8, 32>}, {pipeline_mode = #tpu.pipeline_mode<synchronous>, transform_indices = @transform_1, window_bounds = array<i64: 4, 32, 8>}, {pipeline_mode = #tpu.pipeline_mode<synchronous>, transform_indices = @transform_2, window_bounds = array<i64: 4, 8, 1>}, {pipeline_mode = #tpu.pipeline_mode<synchronous>, transform_indices = @transform_3, window_bounds = array<i64: 4, 32, 8>}, {pipeline_mode = #tpu.pipeline_mode<synchronous>, transform_indices = @transform_4, window_bounds = array<i64: 4, 8, 1>}, {pipeline_mode = #tpu.pipeline_mode<synchronous>, transform_indices = @transform_5, window_bounds = array<i64: 4, 32, 8>}, {pipeline_mode = #tpu.pipeline_mode<synchronous>, transform_indices = @transform_6, window_bounds = array<i64: 4, 8, 1>}, {pipeline_mode = #tpu.pipeline_mode<synchronous>, transform_indices = @transform_7, window_bounds = array<i64: 4, 8, 32>}, {pipeline_mode = #tpu.pipeline_mode<synchronous>, transform_indices = @transform_8, window_bounds = array<i64: 1, 32>}, {transform_indices = @transform_9, window_bounds = array<i64: 1, 8, 32>}]} {
    %c0 = arith.constant 0 : index
    %c0_0 = arith.constant 0 : index
    %c0_1 = arith.constant 0 : index
    %0 = vector.load %arg1[%c0, %c0_0, %c0_1] : memref<1x8x32xf32, #tpu.memory_space<vmem>>, vector<1x8x32xf32>
    %1 = vector.shape_cast %0 : vector<1x8x32xf32> to vector<8x32xf32>
    %c0_2 = arith.constant 0 : index
    %c0_3 = arith.constant 0 : index
    %c0_4 = arith.constant 0 : index
    %2 = vector.load %arg2[%c0_2, %c0_3, %c0_4] : memref<4x32x8xf32, #tpu.memory_space<vmem>>, vector<4x32x8xf32>
    %cst = arith.constant dense<0.000000e+00> : vector<4x8x8xf32>
    %3 = tpu.matmul %2, %1, %cst {dimension_numbers = #tpu.dot_dimension_numbers<[1], [1], [0, 2], [0], [0, 0, 0, 2, 1, 0], [], []>} : vector<4x32x8xf32>, vector<8x32xf32>, vector<4x8x8xf32> -> vector<4x8x8xf32>
    %c0_5 = arith.constant 0 : index
    %c0_6 = arith.constant 0 : index
    %c0_7 = arith.constant 0 : index
    %4 = vector.load %arg3[%c0_5, %c0_6, %c0_7] : memref<4x8x1xf32, #tpu.memory_space<vmem>>, vector<4x8x1xf32>
    %5 = vector.broadcast %4 : vector<4x8x1xf32> to vector<4x8x8xf32>
    %6 = arith.addf %3, %5 : vector<4x8x8xf32>
    %c0_8 = arith.constant 0 : index
    %c0_9 = arith.constant 0 : index
    %c0_10 = arith.constant 0 : index
    %7 = vector.load %arg4[%c0_8, %c0_9, %c0_10] : memref<4x32x8xf32, #tpu.memory_space<vmem>>, vector<4x32x8xf32>
    %cst_11 = arith.constant dense<0.000000e+00> : vector<4x8x8xf32>
    %8 = tpu.matmul %7, %1, %cst_11 {dimension_numbers = #tpu.dot_dimension_numbers<[1], [1], [0, 2], [0], [0, 0, 0, 2, 1, 0], [], []>} : vector<4x32x8xf32>, vector<8x32xf32>, vector<4x8x8xf32> -> vector<4x8x8xf32>
    %c0_12 = arith.constant 0 : index
    %c0_13 = arith.constant 0 : index
    %c0_14 = arith.constant 0 : index
    %9 = vector.load %arg5[%c0_12, %c0_13, %c0_14] : memref<4x8x1xf32, #tpu.memory_space<vmem>>, vector<4x8x1xf32>
    %10 = vector.broadcast %9 : vector<4x8x1xf32> to vector<4x8x8xf32>
    %11 = arith.addf %8, %10 : vector<4x8x8xf32>
    %c0_15 = arith.constant 0 : index
    %c0_16 = arith.constant 0 : index
    %c0_17 = arith.constant 0 : index
    %12 = vector.load %arg6[%c0_15, %c0_16, %c0_17] : memref<4x32x8xf32, #tpu.memory_space<vmem>>, vector<4x32x8xf32>
    %cst_18 = arith.constant dense<0.000000e+00> : vector<4x8x8xf32>
    %13 = tpu.matmul %12, %1, %cst_18 {dimension_numbers = #tpu.dot_dimension_numbers<[1], [1], [0, 2], [0], [0, 0, 0, 2, 1, 0], [], []>} : vector<4x32x8xf32>, vector<8x32xf32>, vector<4x8x8xf32> -> vector<4x8x8xf32>
    %c0_19 = arith.constant 0 : index
    %c0_20 = arith.constant 0 : index
    %c0_21 = arith.constant 0 : index
    %14 = vector.load %arg7[%c0_19, %c0_20, %c0_21] : memref<4x8x1xf32, #tpu.memory_space<vmem>>, vector<4x8x1xf32>
    %15 = vector.broadcast %14 : vector<4x8x1xf32> to vector<4x8x8xf32>
    %16 = arith.addf %13, %15 : vector<4x8x8xf32>
    %cst_22 = arith.constant dense<0.000000e+00> : vector<4x8x8xf32>
    %17 = tpu.matmul %6, %11, %cst_22 {dimension_numbers = #tpu.dot_dimension_numbers<[1], [1], [2], [2], [0, 0, 0, 2, 1, 2], [0], [0]>} : vector<4x8x8xf32>, vector<4x8x8xf32>, vector<4x8x8xf32> -> vector<4x8x8xf32>
    %cst_23 = arith.constant dense<0xFF800000> : vector<4x8xf32>
    %18 = vector.multi_reduction <maximumf>, %17, %cst_23 [2] : vector<4x8x8xf32> to vector<4x8xf32>
    %19 = vector.shape_cast %18 : vector<4x8xf32> to vector<4x8x1xf32>
    %20 = vector.broadcast %19 : vector<4x8x1xf32> to vector<4x8x8xf32>
    %21 = arith.subf %17, %20 : vector<4x8x8xf32>
    %22 = math.exp %21 : vector<4x8x8xf32>
    %cst_24 = arith.constant dense<0.000000e+00> : vector<4x8xf32>
    %23 = vector.multi_reduction <add>, %22, %cst_24 [2] : vector<4x8x8xf32> to vector<4x8xf32>
    %24 = vector.shape_cast %23 : vector<4x8xf32> to vector<4x8x1xf32>
    %25 = tpu.reciprocal %24 {approx = true} : vector<4x8x1xf32> -> vector<4x8x1xf32>
    %26 = vector.broadcast %25 : vector<4x8x1xf32> to vector<4x8x8xf32>
    %27 = arith.mulf %22, %26 : vector<4x8x8xf32>
    %cst_25 = arith.constant dense<0.000000e+00> : vector<4x8x8xf32>
    %28 = tpu.matmul %27, %16, %cst_25 {dimension_numbers = #tpu.dot_dimension_numbers<[2], [2], [1], [1], [0, 0, 0, 1, 1, 1], [0], [0]>} : vector<4x8x8xf32>, vector<4x8x8xf32>, vector<4x8x8xf32> -> vector<4x8x8xf32>
    %c0_26 = arith.constant 0 : index
    %c0_27 = arith.constant 0 : index
    %c0_28 = arith.constant 0 : index
    %29 = vector.load %arg8[%c0_26, %c0_27, %c0_28] : memref<4x8x32xf32, #tpu.memory_space<vmem>>, vector<4x8x32xf32>
    %cst_29 = arith.constant dense<0.000000e+00> : vector<4x8x32xf32>
    %30 = tpu.matmul %28, %29, %cst_29 {dimension_numbers = #tpu.dot_dimension_numbers<[2], [1], [1], [2], [0, 0, 0, 1, 1, 2], [0], [0]>} : vector<4x8x8xf32>, vector<4x8x32xf32>, vector<4x8x32xf32> -> vector<4x8x32xf32>
    %cst_30 = arith.constant dense<0.000000e+00> : vector<8x32xf32>
    %31 = vector.multi_reduction <add>, %30, %cst_30 [0] : vector<4x8x32xf32> to vector<8x32xf32>
    %c0_31 = arith.constant 0 : index
    %c0_32 = arith.constant 0 : index
    %32 = vector.load %arg9[%c0_31, %c0_32] : memref<1x32xf32, #tpu.memory_space<vmem>>, vector<1x32xf32>
    %33 = vector.broadcast %32 : vector<1x32xf32> to vector<8x32xf32>
    %34 = arith.addf %31, %33 : vector<8x32xf32>
    %c0_33 = arith.constant 0 : index
    %c0_34 = arith.constant 0 : index
    %c0_35 = arith.constant 0 : index
    %35 = vector.load %arg10[%c0_33, %c0_34, %c0_35] : memref<1x8x32xf32, #tpu.memory_space<vmem>>, vector<1x8x32xf32>
    %36 = vector.shape_cast %35 : vector<1x8x32xf32> to vector<8x32xf32>
    %37 = vector.shape_cast %34 : vector<8x32xf32> to vector<1x8x32xf32>
    tpu.vector_store %arg10[%c0_33, %c0_34, %c0_35], %37 {strides = array<i32>} : memref<1x8x32xf32, #tpu.memory_space<vmem>>, vector<1x8x32xf32>,
    return
  }
  func.func @transform_0(%arg0: i32) -> (i32, i32, i32) {
    %c0_i32 = arith.constant 0 : i32
    %c0_i32_0 = arith.constant 0 : i32
    %c0_i32_1 = arith.constant 0 : i32
    return %arg0, %c0_i32, %c0_i32_0 : i32, i32, i32
  }
  func.func @transform_1(%arg0: i32) -> (i32, i32, i32) {
    %c0_i32 = arith.constant 0 : i32
    %c0_i32_0 = arith.constant 0 : i32
    %c0_i32_1 = arith.constant 0 : i32
    %c0_i32_2 = arith.constant 0 : i32
    return %c0_i32, %c0_i32_0, %c0_i32_1 : i32, i32, i32
  }
  func.func @transform_2(%arg0: i32) -> (i32, i32, i32) {
    %c0_i32 = arith.constant 0 : i32
    %c0_i32_0 = arith.constant 0 : i32
    %c0_i32_1 = arith.constant 0 : i32
    %c0_i32_2 = arith.constant 0 : i32
    return %c0_i32, %c0_i32_0, %c0_i32_1 : i32, i32, i32
  }
  func.func @transform_3(%arg0: i32) -> (i32, i32, i32) {
    %c0_i32 = arith.constant 0 : i32
    %c0_i32_0 = arith.constant 0 : i32
    %c0_i32_1 = arith.constant 0 : i32
    %c0_i32_2 = arith.constant 0 : i32
    return %c0_i32, %c0_i32_0, %c0_i32_1 : i32, i32, i32
  }
  func.func @transform_4(%arg0: i32) -> (i32, i32, i32) {
    %c0_i32 = arith.constant 0 : i32
    %c0_i32_0 = arith.constant 0 : i32
    %c0_i32_1 = arith.constant 0 : i32
    %c0_i32_2 = arith.constant 0 : i32
    return %c0_i32, %c0_i32_0, %c0_i32_1 : i32, i32, i32
  }
  func.func @transform_5(%arg0: i32) -> (i32, i32, i32) {
    %c0_i32 = arith.constant 0 : i32
    %c0_i32_0 = arith.constant 0 : i32
    %c0_i32_1 = arith.constant 0 : i32
    %c0_i32_2 = arith.constant 0 : i32
    return %c0_i32, %c0_i32_0, %c0_i32_1 : i32, i32, i32
  }
  func.func @transform_6(%arg0: i32) -> (i32, i32, i32) {
    %c0_i32 = arith.constant 0 : i32
    %c0_i32_0 = arith.constant 0 : i32
    %c0_i32_1 = arith.constant 0 : i32
    %c0_i32_2 = arith.constant 0 : i32
    return %c0_i32, %c0_i32_0, %c0_i32_1 : i32, i32, i32
  }
  func.func @transform_7(%arg0: i32) -> (i32, i32, i32) {
    %c0_i32 = arith.constant 0 : i32
    %c0_i32_0 = arith.constant 0 : i32
    %c0_i32_1 = arith.constant 0 : i32
    %c0_i32_2 = arith.constant 0 : i32
    return %c0_i32, %c0_i32_0, %c0_i32_1 : i32, i32, i32
  }
  func.func @transform_8(%arg0: i32) -> (i32, i32) {
    %c0_i32 = arith.constant 0 : i32
    %c0_i32_0 = arith.constant 0 : i32
    %c0_i32_1 = arith.constant 0 : i32
    return %c0_i32, %c0_i32_0 : i32, i32
  }
  func.func @transform_9(%arg0: i32) -> (i32, i32, i32) {
    %c0_i32 = arith.constant 0 : i32
    %c0_i32_0 = arith.constant 0 : i32
    %c0_i32_1 = arith.constant 0 : i32
    return %arg0, %c0_i32, %c0_i32_0 : i32, i32, i32
  }
}

</mosaic_0001>

<bundles_post_ra>
// kernel: tpu_custom_call.1
= control target key start
LH: loop header
LB: loop body
LE: loop exit
PB: predicated region body
PF: predicated region fallthrough
CT: control target
= control target key end

     0   :  { %14 = vsyncpa [#allocation3], 0  ;;  %s3017_s0 = inlined_call_operand.vmem [shape: f32[2,8,32], index: 0, kind: input, shape index: {}]   ;;  %s3018_s1 = inlined_call_operand.vmem [shape: f32[4,32,8], index: 1, kind: input, shape index: {}]   ;;  %s3019_s2 = inlined_call_operand.vmem [shape: f32[4,8,1], index: 2, kind: input, shape index: {}]   ;;  %s3020_s3 = inlined_call_operand.vmem [shape: f32[4,32,8], index: 3, kind: input, shape index: {}]   ;;  %s3021_s4 = inlined_call_operand.vmem [shape: f32[4,8,1], index: 4, kind: input, shape index: {}]   ;;  %s3022_s5 = inlined_call_operand.vmem [shape: f32[4,32,8], index: 5, kind: input, shape index: {}]   ;;  %s3023_s6 = inlined_call_operand.vmem [shape: f32[4,8,1], index: 6, kind: input, shape index: {}]   ;;  %s3024_s7 = inlined_call_operand.vmem [shape: f32[4,8,32], index: 7, kind: input, shape index: {}]   ;;  %s3025_s8 = inlined_call_operand.vmem [shape: f32[1,32], index: 8, kind: input, shape index: {}]   ;;  %s3026_s9 = inlined_call_operand.hbm [shape: f32[2,8,32], index: 9, kind: output, shape index: {}]  }
   0x1   :  { %16 = vsyncpa [#allocation3 + $0x1], 0  ;;  %s2625_s30 = smov 0   ;;  %s2627_s10 = smov 0  }
   0x2   :  { %s2629_s11 = smov 0   ;;  %s2631_s12 = smov 0  }
   0x3 LB: > { %s2646_s13 = sadd.s32 4294967295, %s2569_s12   ;;  %s2282_s14 = sadd.s32 4294967294, %s2569_s12   ;;  %s2569_s12 = sphi %s2631_s12, %s3032_s12   ;;  %s2565_s11 = sphi %s2629_s11, %s3031_s11   ;;  %s2561_s10 = sphi %s2627_s10, %s3030_s10   ;;  %s2557_s30 = sphi %s2625_s30, %s3029_s30  }
   0x4   : > { %s2650_s15 = sadd.s32 1, %s2569_s12   ;;  %s223_s16 = sadd.s32 1, %s2565_s11 }
   0x5   : > { %s220_s17 = ssub.s32 %s2569_s12, %s2650_s15  ;;  %p233_p0 = scmp.ne.s32.totalorder %s2565_s11, %s2561_s10 }
   0x6   : > { %p221_p1 = scmp.eq.s32.totalorder %s220_s17, 0  ;;  %p234_p2 = scmp.eq.s32.totalorder %s2646_s13, 1 }
   0x7   : > { %p239_p3 = scmp.ne.s32.totalorder %s2561_s10, %s2557_s30  ;;  %p240_p4 = scmp.eq.s32.totalorder %s2282_s14, 1 }
   0x8   : > { %s2661_s18 = scalar_select %p221_p1, %s2565_s11, %s223_s16  }
   0x9   : > { %p2663_p5 = por %p234_p2, %p233_p0  ;;  %p2667_p6 = por %p240_p4, %p239_p3 }
   0xa   : > { %p2285_p7 = scmp.ge.s32.totalorder %s2569_s12, 1  ;;  %p289_p8 = scmp.lt.s32.totalorder %s2569_s12, 3 }
   0xc   : > { %p290_p9 = pnand %p2285_p7, %p289_p8 }
   0xd   : > { %v329_v0 = vld [vmem:[%s3018_s1] sm:$0xff] (!%p290_p9)  ;;  %p324_p10 = scmp.lt.s32.totalorder (!%p290_p9), %s2646_s13, 1  ;;  %v330_v2 = vld [vmem:[%s3018_s1 + $0x8] sm:$0xff] (!%p290_p9)  ;;  %v331_v4 = vld [vmem:[%s3018_s1 + $0x10] sm:$0xff] (!%p290_p9)  ;;  %vm497_vm0 = vcmask (!%p290_p9), 261120   ;;  %v2571_v34 = vmov (!%p290_p9), 0  }
   0xe   : > { %293 = sbr.rel (%p290_p9) target bundleno = 1479 (0x5c7), region = 56  ;;  %v333_v1 = vld [vmem:[%s3018_s1 + $0x20] sm:$0xff] (!%p290_p9)  ;;  %369 = vxpose.xlu0.b32.start [1/4] (short) (narrow) (!%p290_p9), %v329_v0, 8  ;;  %v334_v3 = vld [vmem:[%s3018_s1 + $0x28] sm:$0xff] (!%p290_p9)  ;;  %v335_v5 = vld [vmem:[%s3018_s1 + $0x30] sm:$0xff] (!%p290_p9)  ;;  %vm2573_vm1 = vmmov (!%p290_p9), 0  }
   0xf   : > { %401 = vxpose.xlu1.b32.start [1/4] (short) (narrow) (!%p290_p9), %v333_v1, 8  ;;  %v332_v6 = vld [vmem:[%s3018_s1 + $0x18] sm:$0xff] (!%p290_p9)  ;;  %v337_v9 = vld [vmem:[%s3018_s1 + $0x40] sm:$0xff] (!%p290_p9)  ;;  %v338_v11 = vld [vmem:[%s3018_s1 + $0x48] sm:$0xff] (!%p290_p9)  ;;  %vm1160_vm2 = vcmask (!%p290_p9), 64512   ;;  %s321_s22 = sand.u32 (!%p290_p9), 1, %s2561_s10  }
  0x10   : > { %v336_v7 = vld [vmem:[%s3018_s1 + $0x38] sm:$0xff] (!%p290_p9)  ;;  %v341_v10 = vld [vmem:[%s3018_s1 + $0x60] sm:$0xff] (!%p290_p9)  ;;  %v342_v12 = vld [vmem:[%s3018_s1 + $0x68] sm:$0xff] (!%p290_p9)  ;;  %s2286_s23 = sshll.u32 (!%p290_p9), %s321_s22, 3  ;;  %s2321_s26 = sshll.u32 (!%p290_p9), %s2646_s13, 7 }
  0x11   : > { %v339_v13 = vld [vmem:[%s3018_s1 + $0x50] sm:$0xff] (!%p290_p9)  ;;  %v340_v15 = vld [vmem:[%s3018_s1 + $0x58] sm:$0xff] (!%p290_p9)  ;;  %v598_v17 = vld [vmem:[%s3020_s3] sm:$0xff] (!%p290_p9)  ;;  %s323_s27 = scalar_lea.vmem (!%p290_p9), [#allocation2], %s2286_s23  ;;  %s2974_s16 = scalar_lea.hbm (!%p290_p9), %s3026_s9, %s2321_s26 }
  0x12   : > { %370 = vxpose.xlu0.b32.cont [2/4] (short) (narrow) (!%p290_p9), %v330_v2, 8  ;;  %v343_v14 = vld [vmem:[%s3018_s1 + $0x70] sm:$0xff] (!%p290_p9)  ;;  %v344_v16 = vld [vmem:[%s3018_s1 + $0x78] sm:$0xff] (!%p290_p9)  ;;  %v602_v18 = vld [vmem:[%s3020_s3 + $0x20] sm:$0xff] (!%p290_p9)  ;;  %s2223_s28 = sshll.u32 (!%p290_p9), %s323_s27, 4  ;;  %s2210_s17 = scalar_lea.sflag (!%p290_p9), [#allocation3], %s321_s22  ;;  %s2976_s28 = int_to_ptr.vmem [resolvable:$true] %s2223_s28 }
  0x13   : > { %402 = vxpose.xlu1.b32.cont [2/4] (short) (narrow) (!%p290_p9), %v334_v3, 8  ;;  %v599_v19 = vld [vmem:[%s3020_s3 + $0x8] sm:$0xff] (!%p290_p9)  ;;  %v600_v21 = vld [vmem:[%s3020_s3 + $0x10] sm:$0xff] (!%p290_p9)  ;;  %v601_v23 = vld [vmem:[%s3020_s3 + $0x18] sm:$0xff] (!%p290_p9)  ;;  %v2572_v3 = vmov (!%p290_p9), 0.0   ;;  %s2507_s21 = scalar_lea.vmem (!%p290_p9), %s2976_s28, 128 }
  0x14   : > { %v603_v20 = vld [vmem:[%s3020_s3 + $0x28] sm:$0xff] (!%p290_p9)  ;;  %v604_v22 = vld [vmem:[%s3020_s3 + $0x30] sm:$0xff] (!%p290_p9)  ;;  %v605_v24 = vld [vmem:[%s3020_s3 + $0x38] sm:$0xff] (!%p290_p9)  ;;  %p2508_p11 = scmp.ne.s32.totalorder (!%p290_p9), %s2976_s28, %s2507_s21 }
  0x15   : > { %s325_s29 = scalar_select %p324_p10, %s2646_s13, 1  ;;  %v606_v25 = vld [vmem:[%s3020_s3 + $0x40] sm:$0xff]  ;;  %v607_v27 = vld [vmem:[%s3020_s3 + $0x48] sm:$0xff]  ;;  %v608_v29 = vld [vmem:[%s3020_s3 + $0x50] sm:$0xff] }
  0x16   : > { %371 = vxpose.xlu0.b32.cont [3/4] (short) (narrow) %v331_v4, 8  ;;  %v610_v26 = vld [vmem:[%s3020_s3 + $0x60] sm:$0xff]  ;;  %v611_v28 = vld [vmem:[%s3020_s3 + $0x68] sm:$0xff]  ;;  %v612_v30 = vld [vmem:[%s3020_s3 + $0x70] sm:$0xff]  ;;  %p2509_p12 = pnand %p2508_p11, %p2663_p5  ;;  %s2574_s13 = smov [#allocation2]  }
  0x17   : > { %s2287_s14 = sshll.u32 %s325_s29, 3  ;;  %403 = vxpose.xlu1.b32.cont [3/4] (short) (narrow) %v335_v5, 8  ;;  %v609_v31 = vld [vmem:[%s3020_s3 + $0x58] sm:$0xff]  ;;  %v346_v33 = vld [vmem:[%s3019_s2 + $0x8] sm:$0xff]  ;;  %v347_v35 = vld [vmem:[%s3019_s2 + $0x10] sm:$0xff]  ;;  %s2511_s23 = sshll.u32 %s2574_s13, 4  ;;  %s2512_s23 = int_to_ptr.vmem [resolvable:$false] %s2511_s23 }
  0x18   : > { %s327_s25 = scalar_lea.vmem %s3017_s0, %s2287_s14  ;;  %v613_v32 = vld [vmem:[%s3020_s3 + $0x78] sm:$0xff]  ;;  %v345_v37 = vld [vmem:[%s3019_s2] sm:$0xff]  ;;  %v615_v39 = vld [vmem:[%s3021_s4 + $0x8] sm:$0xff]  ;;  %p2510_p13 = pneg %p2509_p12 }
  0x19   : > { %v2702_v8 = vld [vmem:[%s327_s25] sm:$0xff]  ;;  %v348_v36 = vld [vmem:[%s3019_s2 + $0x18] sm:$0xff]  ;;  %v616_v40 = vld [vmem:[%s3021_s4 + $0x10] sm:$0xff]  ;;  %s2513_s24 = scalar_lea.vmem %s2512_s23, 256  ;;  %p2514_p0 = scmp.lt.s32.totalorder %s2976_s28, %s2512_s23 }
  0x1a   : > { %2363 = vmatprep.subr.msk.mxu0 %vm497_vm0, %v2702_v8  ;;  %2371 = vmatprep.subr.msk.mxu1 %vm497_vm0, %v2702_v8  ;;  %v614_v38 = vld [vmem:[%s3021_s4] sm:$0xff]  ;;  %v617_v41 = vld [vmem:[%s3021_s4 + $0x18] sm:$0xff]  ;;  %v868_v45 = vld [vmem:[%s3022_s5 + $0x28] sm:$0xff]  ;;  %p2515_p1 = scmp.lt.s32.totalorder %s2513_s24, %s2507_s21 }
  0x1b   : > { %2364 = vmatpush3.xpose.msk.msra.mxu0 %vm497_vm0, %v2702_v8  ;;  %2372 = vmatpush3.xpose.msk.msra.mxu1 %vm497_vm0, %v2702_v8  ;;  %v867_v44 = vld [vmem:[%s3022_s5 + $0x20] sm:$0xff]  ;;  %v869_v49 = vld [vmem:[%s3022_s5 + $0x30] sm:$0xff]  ;;  %v864_v50 = vld [vmem:[%s3022_s5 + $0x8] sm:$0xff] }
  0x1c   : > { %372 = vxpose.xlu0.b32.end [4/4] (short) (narrow) %v332_v6, 8  ;;  %404 = vxpose.xlu1.b32.end [4/4] (short) (narrow) %v336_v7, 8  ;;  %v863_v48 = vld [vmem:[%s3022_s5] sm:$0xff]  ;;  %v870_v51 = vld [vmem:[%s3022_s5 + $0x38] sm:$0xff]  ;;  %v865_v52 = vld [vmem:[%s3022_s5 + $0x10] sm:$0xff]  ;;  %p2516_p2 = por %p2515_p1, %p2514_p0 }
  0x1d   : > { %2379 = vmatprep.subr.msk.mxu0 %vm497_vm0, %v2702_v8  ;;  %v871_v53 = vld [vmem:[%s3022_s5 + $0x40] sm:$0xff]  ;;  %v866_v54 = vld [vmem:[%s3022_s5 + $0x18] sm:$0xff]  ;;  %v872_v55 = vld [vmem:[%s3022_s5 + $0x48] sm:$0xff]  ;;  %2387 = vmatprep.subr.mxu1 %v2572_v3 }
  0x1e   : > { %v873_v58 = vld [vmem:[%s3022_s5 + $0x50] sm:$0xff]  ;;  %v874_v59 = vld [vmem:[%s3022_s5 + $0x58] sm:$0xff]  ;;  %v875_v62 = vld [vmem:[%s3022_s5 + $0x60] sm:$0xff]  ;;  %p2517_p3 = pnand %p2516_p2, %p2510_p13 }
  0x1f   : > { %v876_v63 = vld [vmem:[%s3022_s5 + $0x68] sm:$0xff]  ;;  %v877_v0 = vld [vmem:[%s3022_s5 + $0x70] sm:$0xff]  ;;  %v878_v1 = vld [vmem:[%s3022_s5 + $0x78] sm:$0xff] }
  0x20   : > { %433 = vxpose.xlu0.b32.start [1/4] (short) (narrow) %v337_v9, 8  ;;  %465 = vxpose.xlu1.b32.start [1/4] (short) (narrow) %v341_v10, 8 }
  0x24   : > { %434 = vxpose.xlu0.b32.cont [2/4] (short) (narrow) %v338_v11, 8  ;;  %466 = vxpose.xlu1.b32.cont [2/4] (short) (narrow) %v342_v12, 8 }
  0x28   : > { %435 = vxpose.xlu0.b32.cont [3/4] (short) (narrow) %v339_v13, 8  ;;  %467 = vxpose.xlu1.b32.cont [3/4] (short) (narrow) %v343_v14, 8 }
  0x2c   : > { %436 = vxpose.xlu0.b32.end [4/4] (short) (narrow) %v340_v15, 8  ;;  %468 = vxpose.xlu1.b32.end [4/4] (short) (narrow) %v344_v16, 8 }
  0x30   : > { %638 = vxpose.xlu0.b32.start [1/4] (short) (narrow) %v598_v17, 8  ;;  %670 = vxpose.xlu1.b32.start [1/4] (short) (narrow) %v602_v18, 8 }
  0x34   : > { %639 = vxpose.xlu0.b32.cont [2/4] (short) (narrow) %v599_v19, 8  ;;  %671 = vxpose.xlu1.b32.cont [2/4] (short) (narrow) %v603_v20, 8 }
  0x38   : > { %640 = vxpose.xlu0.b32.cont [3/4] (short) (narrow) %v600_v21, 8  ;;  %672 = vxpose.xlu1.b32.cont [3/4] (short) (narrow) %v604_v22, 8 }
  0x3c   : > { %641 = vxpose.xlu0.b32.end [4/4] (short) (narrow) %v601_v23, 8  ;;  %673 = vxpose.xlu1.b32.end [4/4] (short) (narrow) %v605_v24, 8 }
  0x40   : > { %702 = vxpose.xlu0.b32.start [1/4] (short) (narrow) %v606_v25, 8  ;;  %734 = vxpose.xlu1.b32.start [1/4] (short) (narrow) %v610_v26, 8 }
  0x44   : > { %703 = vxpose.xlu0.b32.cont [2/4] (short) (narrow) %v607_v27, 8  ;;  %735 = vxpose.xlu1.b32.cont [2/4] (short) (narrow) %v611_v28, 8 }
  0x48   : > { %704 = vxpose.xlu0.b32.cont [3/4] (short) (narrow) %v608_v29, 8  ;;  %736 = vxpose.xlu1.b32.cont [3/4] (short) (narrow) %v612_v30, 8 }
  0x4c   : > { %705 = vxpose.xlu0.b32.end [4/4] (short) (narrow) %v609_v31, 8  ;;  %737 = vxpose.xlu1.b32.end [4/4] (short) (narrow) %v613_v32, 8 }
  0x6a   : > { %2490 = vset.pattern.permute.xlu1 %v2571_v34 }
  0x6b   : > { %356 = vperm.xlu1 %2490, %v346_v33  }
  0x6f   : > { %361 = vperm.xlu1 %2490, %v347_v35  }
  0x73   : > { %366 = vperm.xlu1 %2490, %v348_v36  }
  0x75   : > { %2489 = vset.pattern.permute.xlu0 %v2571_v34 }
  0x76   : > { %351 = vperm.xlu0 %2489, %v345_v37  }
  0x77   : > { %620 = vperm.xlu1 %2490, %v614_v38  }
  0x7a   : > { %625 = vperm.xlu0 %2489, %v615_v39  }
  0x7b   : > { %630 = vperm.xlu1 %2490, %v616_v40  }
  0x7e   : > { %635 = vperm.xlu0 %2489, %v617_v41  }
  0x90   : > { %v385_v42 = vpop.trf.xlu0  ;;  %v417_v43 = vpop.trf.xlu1 }
  0x91   : > { %2365 = vmatprep.mubr.msk.f32.mxu0 %vm497_vm0, %v385_v42 }
  0x92   : > { %2366 = vmatmul.mubr.msk.f32.vlgmr.msra.gmra.mrb[0].mxu0 %vm497_vm0, %v417_v43 }
  0x93   : > { %2380 = vmatpush3.xpose.msk.msra.mxu0 %vm497_vm0, %v2702_v8 }
  0x94   : > { %2397 = vmatprep.subr.mxu0 %v2572_v3 }
  0x9c   : > { %935 = vxpose.xlu0.b32.start [1/4] (short) (narrow) %v867_v44, 8 }
  0xa0   : > { %v449_v46 = vpop.trf.xlu0  ;;  %v481_v47 = vpop.trf.xlu1  ;;  %936 = vxpose.xlu0.b32.cont [2/4] (short) (narrow) %v868_v45, 8 }
  0xa1   : > { %2368 = vmatprep.mubr.msk.f32.mxu0 %vm497_vm0, %v449_v46 }
  0xa2   : > { %2369 = vmatmul.mubr.msk.f32.gmra.mrb[2].mxu0 %vm497_vm0, %v481_v47 }
  0xa4   : > { %903 = vxpose.xlu1.b32.start [1/4] (short) (narrow) %v863_v48, 8  ;;  %937 = vxpose.xlu0.b32.cont [3/4] (short) (narrow) %v869_v49, 8 }
  0xa8   : > { %904 = vxpose.xlu1.b32.cont [2/4] (short) (narrow) %v864_v50, 8  ;;  %938 = vxpose.xlu0.b32.end [4/4] (short) (narrow) %v870_v51, 8  ;;  %v879_v51 = vld [vmem:[%s3023_s6] sm:$0xff] }
  0xac   : > { %905 = vxpose.xlu1.b32.cont [3/4] (short) (narrow) %v865_v52, 8  ;;  %967 = vxpose.xlu0.b32.start [1/4] (short) (narrow) %v871_v53, 8  ;;  %v880_v52 = vld [vmem:[%s3023_s6 + $0x8] sm:$0xff] }
  0xb0   : > { %v654_v56 = vpop.trf.xlu0  ;;  %v686_v57 = vpop.trf.xlu1  ;;  %906 = vxpose.xlu1.b32.end [4/4] (short) (narrow) %v866_v54, 8  ;;  %968 = vxpose.xlu0.b32.cont [2/4] (short) (narrow) %v872_v55, 8 }
  0xb1   : > { %2373 = vmatprep.mubr.msk.f32.mxu1 %vm497_vm0, %v654_v56 }
  0xb2   : > { %2374 = vmatmul.mubr.msk.f32.vlgmr.msra.gmra.mrb[0].mxu1 %vm497_vm0, %v686_v57 }
  0xb4   : > { %969 = vxpose.xlu0.b32.cont [3/4] (short) (narrow) %v873_v58, 8  ;;  %999 = vxpose.xlu1.b32.start [1/4] (short) (narrow) %v875_v62, 8 }
  0xb8   : > { %970 = vxpose.xlu0.b32.end [4/4] (short) (narrow) %v874_v59, 8  ;;  %1000 = vxpose.xlu1.b32.cont [2/4] (short) (narrow) %v876_v63, 8 }
  0xbc   : > { %1001 = vxpose.xlu1.b32.cont [3/4] (short) (narrow) %v877_v0, 8 }
  0xc0   : > { %v718_v60 = vpop.trf.xlu0  ;;  %v750_v61 = vpop.trf.xlu1  ;;  %1002 = vxpose.xlu1.b32.end [4/4] (short) (narrow) %v878_v1, 8 }
  0xc1   : > { %2376 = vmatprep.mubr.msk.f32.mxu1 %vm497_vm0, %v718_v60 }
  0xc2   : > { %2377 = vmatmul.mubr.msk.f32.gmra.mrb[2].mxu1 %vm497_vm0, %v750_v61 }
  0xc3   : > { %2389 = vmatprep.mubr.msk.f32.mxu1 %vm2573_vm1, %v2572_v3 }
  0xea   : > { %v357_v2 = vpop.permute.xlu1 %356 }
  0xee   : > { %v362_v4 = vpop.permute.xlu1 %361 }
  0xf2   : > { %v367_v6 = vpop.permute.xlu1 %366 }
  0xf5   : > { %v352_v5 = vpop.permute.xlu0 %351 }
  0xf6   : > { %v621_v8 = vpop.permute.xlu1 %620 }
  0xf9   : > { %v626_v7 = vpop.permute.xlu0 %625 }
  0xfa   : > { %v631_v10 = vpop.permute.xlu1 %630 }
  0xfd   : > { %v636_v9 = vpop.permute.xlu0 %635 }
 0x11c   : > { %v951_v11 = vpop.trf.xlu0 }
 0x124   : > { %v919_v12 = vpop.trf.xlu1 }
 0x125   : > { %2381 = vmatprep.mubr.msk.f32.mxu0 %vm497_vm0, %v919_v12 }
 0x126   : > { %2382 = vmatmul.mubr.msk.f32.vlgmr.msra.gmra.mrb[4].mxu0 %vm497_vm0, %v951_v11 }
 0x12c   : > { %v983_v13 = vpop.trf.xlu0 }
 0x12d   : > { %2384 = vmatprep.mubr.msk.f32.mxu0 %vm497_vm0, %v983_v13 }
 0x134   : > { %v1015_v18 = vpop.trf.xlu1 }
 0x135   : > { %2385 = vmatmul.mubr.msk.f32.gmra.mrb[6].mxu0 %vm497_vm0, %v1015_v18 }
 0x136   : > { %2399 = vmatprep.mubr.msk.f32.mxu0 %vm2573_vm1, %v2572_v3 }
 0x165   : > { %v2367_v14 = vpop.f32.mrb[0].mxu0 }
 0x166   : > { %v579_v15 = vpop.f32.mrb[1].mxu0  ;;  %v585_v17 = vadd.f32 %v2367_v14, %v357_v2  ;;  %v881_v14 = vld [vmem:[%s3023_s6 + $0x10] sm:$0xff] }
 0x167   : > { %v580_v16 = vadd.f32 %v579_v15, %v352_v5  ;;  %v882_v15 = vld [vmem:[%s3023_s6 + $0x18] sm:$0xff] }
 0x169   : > { %1128 = vxpose.xlu0.b32.start.end [1/1] (short) (narrow) %v580_v16, 8 }
 0x16d   : > { %1234 = vxpose.xlu0.b32.start.end [1/1] (short) (narrow) %v585_v17, 8 }
 0x175   : > { %v2370_v19 = vpop.f32.mrb[2].mxu0 }
 0x176   : > { %v595_v20 = vadd.f32 %v2370_v19, %v367_v6  ;;  %v589_v21 = vpop.f32.mrb[3].mxu0 }
 0x177   : > { %v590_v22 = vadd.f32 %v589_v21, %v362_v4 }
 0x178   : > { %1444 = vxpose.xlu1.b32.start.end [1/1] (short) (narrow) %v595_v20, 8 }
 0x179   : > { %1339 = vxpose.xlu0.b32.start.end [1/1] (short) (narrow) %v590_v22, 8 }
 0x185   : > { %v2375_v23 = vpop.f32.mrb[0].mxu1 }
 0x186   : > { %v844_v24 = vpop.f32.mrb[1].mxu1  ;;  %v850_v29 = vadd.f32 %v2375_v23, %v626_v7 }
 0x187   : > { %v845_v25 = vadd.f32 %v844_v24, %v621_v8 }
 0x189   : > { %2388 = vmatpush3.msra.mxu1 %v845_v25 }
 0x18a   : > { %2392 = vmatprep.subr.mxu1 %v2572_v3 }
 0x195   : > { %v2378_v26 = vpop.f32.mrb[2].mxu1 }
 0x196   : > { %v854_v27 = vpop.f32.mrb[3].mxu1  ;;  %v860_v31 = vadd.f32 %v2378_v26, %v636_v9 }
 0x197   : > { %v855_v28 = vadd.f32 %v854_v27, %v631_v10 }
 0x199   : > { %2398 = vmatpush3.msra.mxu0 %v855_v28 }
 0x19a   : > { %2407 = vmatprep.subr.mxu0 %v2572_v3 }
 0x1e9   : > { %v1144_v30 = vpop.trf.xlu0 }
 0x1ea   : > { %2390 = vmatmul.mubr.msk.f32.vlgmr.msra.gmra.mrb[4].mxu1 %vm1160_vm2, %v1144_v30 }
 0x1eb   : > { %2393 = vmatpush3.msra.mxu1 %v850_v29  ;;  %2394 = vmatprep.mubr.msk.f32.mxu1 %vm2573_vm1, %v2572_v3 }
 0x1ec   : > { %2402 = vmatprep.subr.mxu1 %v2572_v3 }
 0x1ed   : > { %v1250_v32 = vpop.trf.xlu0 }
 0x1ee   : > { %2395 = vmatmul.mubr.msk.f32.vlgmr.msra.gmra.mrb[6].mxu1 %vm1160_vm2, %v1250_v32  ;;  %v1897_v32 = vld [vmem:[%s3024_s7] sm:$0xff] }
 0x1ef   : > { %2403 = vmatpush3.msra.mxu1 %v860_v31  ;;  %2404 = vmatprep.mubr.msk.f32.mxu1 %vm2573_vm1, %v2572_v3 }
 0x1f0   : > { %2412 = vmatprep.subr.mxu1 %v2572_v3 }
 0x1f8   : > { %v1460_v33 = vpop.trf.xlu1 }
 0x1f9   : > { %v1355_v34 = vpop.trf.xlu0  ;;  %2405 = vmatmul.mubr.msk.f32.vlgmr.msra.gmra.mrb[8].mxu1 %vm1160_vm2, %v1460_v33  ;;  %v2383_v35 = vpop.f32.mrb[4].mxu0  ;;  %v1898_v33 = vld [vmem:[%s3024_s7 + $0x8] sm:$0xff] }
 0x1fa   : > { %2400 = vmatmul.mubr.msk.f32.vlgmr.msra.gmra.mrb[8].mxu0 %vm1160_vm2, %v1355_v34  ;;  %v1109_v36 = vpop.f32.mrb[5].mxu0  ;;  %2414 = vmatprep.mubr.msk.f32.mxu1 %vm2573_vm1, %v2572_v3  ;;  %v1899_v34 = vld [vmem:[%s3024_s7 + $0x10] sm:$0xff] }
 0x1fb   : > { %2409 = vmatprep.mubr.msk.f32.mxu0 %vm2573_vm1, %v2572_v3 }
 0x208   : > { %v2894_v37 = vpop.f32.mrb[6].mxu0 }
 0x209   : > { %v2896_v38 = vpop.f32.mrb[7].mxu0 }
 0x2bd   : > { %v1230_v39 = vpop.f32.mrb[4].mxu1 }
 0x2be   : > { %v1549_v40 = vsel %vm1160_vm2, %v1230_v39, -inf  ;;  %v2391_v41 = vpop.f32.mrb[5].mxu1 }
 0x2bf   : > { %1550 = vmax.xlane.f32.xlu0 %v1549_v40 }
 0x2c1   : > { %v1335_v42 = vpop.f32.mrb[6].mxu1 }
 0x2c2   : > { %v1552_v43 = vsel %vm1160_vm2, %v1335_v42, -inf  ;;  %v2396_v44 = vpop.f32.mrb[7].mxu1 }
 0x2c3   : > { %1553 = vmax.xlane.f32.xlu1 %v1552_v43 }
 0x2cc   : > { %v1545_v45 = vpop.f32.mrb[8].mxu1 }
 0x2cd   : > { %v1440_v46 = vpop.f32.mrb[8].mxu0  ;;  %v2406_v47 = vpop.f32.mrb[9].mxu1  ;;  %v1558_v50 = vsel %vm1160_vm2, %v1545_v45, -inf }
 0x2ce   : > { %v2401_v48 = vpop.f32.mrb[9].mxu0  ;;  %v1555_v49 = vsel %vm1160_vm2, %v1440_v46, -inf }
 0x2cf   : > { %1556 = vmax.xlane.f32.xlu1 %v1555_v49 }
 0x2d3   : > { %1559 = vmax.xlane.f32.xlu1 %v1558_v50 }
 0x2d5   : > { %885 = vperm.xlu0 %2489, %v879_v51  }
 0x2e4   : > { %890 = vperm.xlu1 %2490, %v880_v52  }
 0x34c   : > { %v1551_v53 = vpop.xlane.xlu0 %1550 }
 0x34d   : > { %v1561_v54 = vsub.f32 %v1230_v39, %v1551_v53 }
 0x34f   : > { %v1565_v55 = vmul.f32 1.442695, %v1561_v54 }
 0x350   : > { %v1554_v56 = vpop.xlane.xlu1 %1553 }
 0x351   : > { %2491 = vpow2.f32 %v1565_v55  ;;  %v1562_v57 = vsub.f32 %v1335_v42, %v1554_v56  ;;  %v2319_v56 = vld [vmem:[%s3025_s8] ss:$0 sm:$0xff] }
 0x353   : > { %v1567_v58 = vmul.f32 1.442695, %v1562_v57 }
 0x354   : > { %v886_v59 = vpop.permute.xlu0 %885 }
 0x355   : > { %2493 = vpow2.f32 %v1567_v58  ;;  %v1110_v60 = vadd.f32 %v1109_v36, %v886_v59 }
 0x357   : > { %2408 = vmatpush3.xpose.msk.msra.mxu0 %vm1160_vm2, %v1110_v60 }
 0x358   : > { %2417 = vmatprep.subr.mxu0 %v2572_v3 }
 0x35b   : > { %v2492_v61 = vpop.eup %2491 }
 0x35c   : > { %v1557_v62 = vpop.xlane.xlu1 %1556  ;;  %v1573_v63 = vsel %vm1160_vm2, %v2492_v61, 0.0 }
 0x35d   : > { %v1563_v0 = vsub.f32 %v1440_v46, %v1557_v62  ;;  %1574 = vadd.xlane.f32.xlu0 %v1573_v63 }
 0x35f   : > { %v2494_v1 = vpop.eup %2493  ;;  %v1569_v2 = vmul.f32 1.442695, %v1563_v0 }
 0x360   : > { %v1560_v4 = vpop.xlane.xlu1 %1559  ;;  %v1576_v5 = vsel %vm1160_vm2, %v2494_v1, 0.0 }
 0x361   : > { %2495 = vpow2.f32 %v1569_v2  ;;  %v1564_v6 = vsub.f32 %v1545_v45, %v1560_v4  ;;  %1577 = vadd.xlane.f32.xlu1 %v1576_v5 }
 0x363   : > { %v1571_v7 = vmul.f32 1.442695, %v1564_v6 }
 0x364   : > { %v891_v8 = vpop.permute.xlu1 %890 }
 0x365   : > { %2497 = vpow2.f32 %v1571_v7  ;;  %v1115_v9 = vadd.f32 %v2383_v35, %v891_v8 }
 0x367   : > { %2413 = vmatpush3.xpose.msk.msra.mxu1 %vm1160_vm2, %v1115_v9 }
 0x368   : > { %2422 = vmatprep.subr.mxu1 %v2572_v3 }
 0x36b   : > { %v2496_v10 = vpop.eup %2495 }
 0x36c   : > { %v1579_v11 = vsel %vm1160_vm2, %v2496_v10, 0.0 }
 0x36d   : > { %1580 = vadd.xlane.f32.xlu0 %v1579_v11 }
 0x36f   : > { %v2498_v12 = vpop.eup %2497 }
 0x370   : > { %v1582_v13 = vsel %vm1160_vm2, %v2498_v12, 0.0 }
 0x371   : > { %1583 = vadd.xlane.f32.xlu1 %v1582_v13 }
 0x382   : > { %895 = vperm.xlu1 %2490, %v881_v14  }
 0x383   : > { %900 = vperm.xlu0 %2489, %v882_v15  }
 0x3ea   : > { %v1575_v16 = vpop.xlane.xlu0 %1574 }
 0x3eb   : > { %2499 = vrcp.f32 %v1575_v16 }
 0x3ee   : > { %v1578_v17 = vpop.xlane.xlu1 %1577 }
 0x3ef   : > { %2501 = vrcp.f32 %v1578_v17 }
 0x3f5   : > { %v2500_v18 = vpop.eup %2499 }
 0x3f6   : > { %v1589_v19 = vmul.f32 %v2500_v18, %v2492_v61 }
 0x3f8   : > { %2410 = vmatmul.mubr.msk.f32.vlgmr.msra.gmra.mrb[10].mxu0 %vm1160_vm2, %v1589_v19 }
 0x3f9   : > { %v2502_v20 = vpop.eup %2501  ;;  %2419 = vmatprep.mubr.msk.f32.mxu0 %vm2573_vm1, %v2572_v3 }
 0x3fa   : > { %v1590_v21 = vmul.f32 %v2502_v20, %v2494_v1  ;;  %v1581_v22 = vpop.xlane.xlu0 %1580 }
 0x3fb   : > { %2503 = vrcp.f32 %v1581_v22 }
 0x3fc   : > { %2415 = vmatmul.mubr.msk.f32.vlgmr.msra.gmra.mrb[10].mxu1 %vm1160_vm2, %v1590_v21 }
 0x3fd   : > { %2424 = vmatprep.mubr.msk.f32.mxu1 %vm2573_vm1, %v2572_v3 }
 0x3fe   : > { %v1584_v23 = vpop.xlane.xlu1 %1583 }
 0x3ff   : > { %2505 = vrcp.f32 %v1584_v23 }
 0x402   : > { %v896_v24 = vpop.permute.xlu1 %895  ;;  %v901_v25 = vpop.permute.xlu0 %900 }
 0x403   : > { %v1120_v26 = vadd.f32 %v2896_v38, %v896_v24  ;;  %v1125_v27 = vadd.f32 %v2894_v37, %v901_v25  ;;  %v1900_v37 = vld [vmem:[%s3024_s7 + $0x18] sm:$0xff] }
 0x405   : > { %v2504_v28 = vpop.eup %2503  ;;  %2418 = vmatpush3.xpose.msk.msra.mxu0 %vm1160_vm2, %v1120_v26  ;;  %2423 = vmatpush3.xpose.msk.msra.mxu1 %vm1160_vm2, %v1125_v27 }
 0x406   : > { %v1591_v29 = vmul.f32 %v2504_v28, %v2496_v10  ;;  %2427 = vmatprep.subr.mxu0 %v2572_v3  ;;  %2432 = vmatprep.subr.mxu1 %v2572_v3 }
 0x408   : > { %2420 = vmatmul.mubr.msk.f32.vlgmr.msra.gmra.mrb[12].mxu0 %vm1160_vm2, %v1591_v29 }
 0x409   : > { %v2506_v30 = vpop.eup %2505  ;;  %2429 = vmatprep.mubr.msk.f32.mxu0 %vm2573_vm1, %v2572_v3  ;;  %2428 = vmatpush3.msra.mxu0 %v1897_v32 }
 0x40a   : > { %v1592_v31 = vmul.f32 %v2506_v30, %v2498_v12  ;;  %2437 = vmatprep.subr.mxu0 %v2572_v3 }
 0x40c   : > { %2425 = vmatmul.mubr.msk.f32.vlgmr.msra.gmra.mrb[12].mxu1 %vm1160_vm2, %v1592_v31 }
 0x40d   : > { %2434 = vmatprep.mubr.msk.f32.mxu1 %vm2573_vm1, %v2572_v3  ;;  %2433 = vmatpush3.msra.mxu1 %v1898_v33 }
 0x40e   : > { %2442 = vmatprep.subr.mxu1 %v2572_v3 }
 0x4cb   : > { %v1665_v35 = vpop.f32.mrb[10].mxu0 }
 0x4cc   : > { %v2411_v36 = vpop.f32.mrb[11].mxu0  ;;  %2430 = vmatmul.mubr.msk.f32.vlgmr.msra.gmra.mrb[14].mxu0 %vm1160_vm2, %v1665_v35 }
 0x4cd   : > { %2438 = vmatpush3.msra.mxu0 %v1899_v34  ;;  %2439 = vmatprep.mubr.msk.f32.mxu0 %vm2573_vm1, %v2572_v3 }
 0x4cf   : > { %v1741_v38 = vpop.f32.mrb[10].mxu1 }
 0x4d0   : > { %v2416_v39 = vpop.f32.mrb[11].mxu1  ;;  %2435 = vmatmul.mubr.msk.f32.vlgmr.msra.gmra.mrb[14].mxu1 %vm1160_vm2, %v1741_v38 }
 0x4d1   : > { %2443 = vmatpush3.msra.mxu1 %v1900_v37  ;;  %2444 = vmatprep.mubr.msk.f32.mxu1 %vm2573_vm1, %v2572_v3 }
 0x4db   : > { %v1817_v40 = vpop.f32.mrb[12].mxu0 }
 0x4dc   : > { %v2421_v41 = vpop.f32.mrb[13].mxu0  ;;  %2440 = vmatmul.mubr.msk.f32.vlgmr.msra.gmra.mrb[16].mxu0 %vm1160_vm2, %v1817_v40 }
 0x4df   : > { %v1893_v42 = vpop.f32.mrb[12].mxu1 }
 0x4e0   : > { %v2426_v43 = vpop.f32.mrb[13].mxu1  ;;  %2445 = vmatmul.mubr.msk.f32.vlgmr.msra.gmra.mrb[16].mxu1 %vm1160_vm2, %v1893_v42 }
 0x59f   : > { %v1970_v44 = vpop.f32.mrb[14].mxu0 }
 0x5a0   : > { %v2431_v45 = vpop.f32.mrb[15].mxu0  ;;  %v2193_v47 = vsel %vm497_vm0, %v1970_v44, 0.0 }
 0x5a3   : > { %v2043_v46 = vpop.f32.mrb[14].mxu1 }
 0x5a4   : > { %v2194_v48 = vsel %vm497_vm0, %v2043_v46, 0.0  ;;  %v2436_v49 = vpop.f32.mrb[15].mxu1 }
 0x5a5   : > { %v2195_v50 = vadd.f32 %v2194_v48, %v2193_v47 }
 0x5af   : > { %v2116_v3 = vpop.f32.mrb[16].mxu0 }
 0x5b0   : > { %v2196_v51 = vsel %vm497_vm0, %v2116_v3, 0.0  ;;  %v2441_v52 = vpop.f32.mrb[17].mxu0 }
 0x5b1   : > { %v2197_v53 = vadd.f32 %v2196_v51, %v2195_v50 }
 0x5b3   : > { %v2189_v54 = vpop.f32.mrb[16].mxu1 }
 0x5b4   : > { %v2198_v55 = vsel %vm497_vm0, %v2189_v54, 0.0  ;;  %v2446_v57 = vpop.f32.mrb[17].mxu1 }
 0x5b5   : > { %v2199_v58 = vadd.f32 %v2198_v55, %v2197_v53 }
 0x5b7   : > { %v2207_v59 = vadd.f32 %v2319_v56, %v2199_v58 }
 0x5b9   : > { %2208 = vst.msk [vmem:[%s323_s27] sm:$0xff] %vm497_vm0, %v2207_v59 }
 0x5ba   : > { %2520 = shalt.err (!%p2517_p3)
}
 0x5bb   : > { %s2521_s22 = scalar_lea.hbm %s2974_s16, 128  ;;  %s2525_s27 = scalar_lea.hbm %s3026_s9, 256 }
 0x5bc   : > { %p2522_p4 = scmp.ne.s32.totalorder %s2974_s16, %s2521_s22  ;;  %p2526_p9 = scmp.lt.u32.totalorder %s2974_s16, %s3026_s9 }
 0x5bd   : > { %p2527_p10 = scmp.lt.u32.totalorder %s2525_s27, %s2521_s22  ;;  %p2529_p12 = scmp.lt.u32.totalorder %s2521_s22, %s2974_s16 }
 0x5be   : > { %p2523_p7 = pnand %p2522_p4, %p2663_p5 }
 0x5bf   : > { %p2528_p11 = por %p2527_p10, %p2526_p9 }
 0x5c0   : > { %p2524_p8 = pneg %p2523_p7 }
 0x5c1   : > { %p2530_p13 = por %p2529_p12, %p2528_p11 }
 0x5c3   : > { %p2531_p0 = pnand %p2530_p13, %p2524_p8 }
 0x5c5   : > { %2534 = shalt.err (!%p2531_p0)
}
 0x5c6   : > { %2447 = dma.vmem_to_hbm [thread:$0]  (%p2663_p5), %s2976_s28, 128, %s2974_s16, %s2210_s17  }
 0x5c7 PF: > { %p2453_p1 = scmp.ge.s32.totalorder %s2569_s12, 2  ;;  %s2235_s21 = sand.u32 1, %s2557_s30  }
 0x5c8   : > { %s2236_s13 = scalar_lea.sflag [#allocation3], %s2235_s21 }
 0x5c9   : > { %p2450_p2 = pnand %p2453_p1, %p2667_p6 }
 0x5cb   : > { %2552 = dma.done.wait (!%p2450_p2), %s2236_s13, 128  }
 0x5cc   : > { %2554 = vsyncadd (!%p2450_p2), %s2236_s13, 4294967168  ;;  %p19_p3 = scmp.ge.s32.totalorder %s2650_s15, 4   ;;  %s3029_s30 = smov %s2561_s10 }
 0x5cd   : > { %s3030_s10 = smov %s2565_s11  ;;  %s3031_s11 = smov %s2661_s18 }
 0x5ce   : > { %s3032_s12 = smov %s2650_s15  ;;  %21 = sbr.rel (!%p19_p3) target bundleno = 3 (0x3), region = 91 }
 0x5d5   :  { %2241 = vsyncpa [#allocation3], 1 }
 0x5d6   :  { %2243 = vsyncpa [#allocation3 + $0x1], 1 }

// kernel: tpu_custom_call.1
= control target key start
LH: loop header
LB: loop body
LE: loop exit
PB: predicated region body
PF: predicated region fallthrough
CT: control target
= control target key end

     0   :  { %14 = vsyncpa [#allocation3], 0  ;;  %s3017_s0 = inlined_call_operand.vmem [shape: f32[2,8,32], index: 0, kind: input, shape index: {}]   ;;  %s3018_s1 = inlined_call_operand.vmem [shape: f32[4,32,8], index: 1, kind: input, shape index: {}]   ;;  %s3019_s2 = inlined_call_operand.vmem [shape: f32[4,8,1], index: 2, kind: input, shape index: {}]   ;;  %s3020_s3 = inlined_call_operand.vmem [shape: f32[4,32,8], index: 3, kind: input, shape index: {}]   ;;  %s3021_s4 = inlined_call_operand.vmem [shape: f32[4,8,1], index: 4, kind: input, shape index: {}]   ;;  %s3022_s5 = inlined_call_operand.vmem [shape: f32[4,32,8], index: 5, kind: input, shape index: {}]   ;;  %s3023_s6 = inlined_call_operand.vmem [shape: f32[4,8,1], index: 6, kind: input, shape index: {}]   ;;  %s3024_s7 = inlined_call_operand.vmem [shape: f32[4,8,32], index: 7, kind: input, shape index: {}]   ;;  %s3025_s8 = inlined_call_operand.vmem [shape: f32[1,32], index: 8, kind: input, shape index: {}]   ;;  %s3026_s9 = inlined_call_operand.hbm [shape: f32[2,8,32], index: 9, kind: output, shape index: {}]  }
   0x1   :  { %16 = vsyncpa [#allocation3 + $0x1], 0  ;;  %s2625_s30 = smov 0   ;;  %s2627_s10 = smov 0  }
   0x2   :  { %s2629_s11 = smov 0   ;;  %s2631_s12 = smov 0  }
   0x3 LB: > { %s2646_s13 = sadd.s32 4294967295, %s2569_s12   ;;  %s2282_s14 = sadd.s32 4294967294, %s2569_s12   ;;  %s2569_s12 = sphi %s2631_s12, %s3032_s12   ;;  %s2565_s11 = sphi %s2629_s11, %s3031_s11   ;;  %s2561_s10 = sphi %s2627_s10, %s3030_s10   ;;  %s2557_s30 = sphi %s2625_s30, %s3029_s30  }
   0x4   : > { %s2650_s15 = sadd.s32 1, %s2569_s12   ;;  %s223_s16 = sadd.s32 1, %s2565_s11 }
   0x5   : > { %s220_s17 = ssub.s32 %s2569_s12, %s2650_s15  ;;  %p233_p0 = scmp.ne.s32.totalorder %s2565_s11, %s2561_s10 }
   0x6   : > { %p221_p1 = scmp.eq.s32.totalorder %s220_s17, 0  ;;  %p234_p2 = scmp.eq.s32.totalorder %s2646_s13, 1 }
   0x7   : > { %p239_p3 = scmp.ne.s32.totalorder %s2561_s10, %s2557_s30  ;;  %p240_p4 = scmp.eq.s32.totalorder %s2282_s14, 1 }
   0x8   : > { %s2661_s18 = scalar_select %p221_p1, %s2565_s11, %s223_s16  }
   0x9   : > { %p2663_p5 = por %p234_p2, %p233_p0  ;;  %p2667_p6 = por %p240_p4, %p239_p3 }
   0xa   : > { %p2285_p7 = scmp.ge.s32.totalorder %s2569_s12, 1  ;;  %p289_p8 = scmp.lt.s32.totalorder %s2569_s12, 3 }
   0xc   : > { %p290_p9 = pnand %p2285_p7, %p289_p8 }
   0xd   : > { %v329_v0 = vld [vmem:[%s3018_s1] sm:$0xff] (!%p290_p9)  ;;  %p324_p10 = scmp.lt.s32.totalorder (!%p290_p9), %s2646_s13, 1  ;;  %v330_v2 = vld [vmem:[%s3018_s1 + $0x8] sm:$0xff] (!%p290_p9)  ;;  %v331_v4 = vld [vmem:[%s3018_s1 + $0x10] sm:$0xff] (!%p290_p9)  ;;  %vm497_vm0 = vcmask (!%p290_p9), 261120   ;;  %v2571_v34 = vmov (!%p290_p9), 0  }
   0xe   : > { %293 = sbr.rel (%p290_p9) target bundleno = 1479 (0x5c7), region = 56  ;;  %v333_v1 = vld [vmem:[%s3018_s1 + $0x20] sm:$0xff] (!%p290_p9)  ;;  %369 = vxpose.xlu0.b32.start [1/4] (short) (narrow) (!%p290_p9), %v329_v0, 8  ;;  %v334_v3 = vld [vmem:[%s3018_s1 + $0x28] sm:$0xff] (!%p290_p9)  ;;  %v335_v5 = vld [vmem:[%s3018_s1 + $0x30] sm:$0xff] (!%p290_p9)  ;;  %vm2573_vm1 = vmmov (!%p290_p9), 0  }
   0xf   : > { %401 = vxpose.xlu1.b32.start [1/4] (short) (narrow) (!%p290_p9), %v333_v1, 8  ;;  %v332_v6 = vld [vmem:[%s3018_s1 + $0x18] sm:$0xff] (!%p290_p9)  ;;  %v337_v9 = vld [vmem:[%s3018_s1 + $0x40] sm:$0xff] (!%p290_p9)  ;;  %v338_v11 = vld [vmem:[%s3018_s1 + $0x48] sm:$0xff] (!%p290_p9)  ;;  %vm1160_vm2 = vcmask (!%p290_p9), 64512   ;;  %s321_s22 = sand.u32 (!%p290_p9), 1, %s2561_s10  }
  0x10   : > { %v336_v7 = vld [vmem:[%s3018_s1 + $0x38] sm:$0xff] (!%p290_p9)  ;;  %v341_v10 = vld [vmem:[%s3018_s1 + $0x60] sm:$0xff] (!%p290_p9)  ;;  %v342_v12 = vld [vmem:[%s3018_s1 + $0x68] sm:$0xff] (!%p290_p9)  ;;  %s2286_s23 = sshll.u32 (!%p290_p9), %s321_s22, 3  ;;  %s2321_s26 = sshll.u32 (!%p290_p9), %s2646_s13, 7 }
  0x11   : > { %v339_v13 = vld [vmem:[%s3018_s1 + $0x50] sm:$0xff] (!%p290_p9)  ;;  %v340_v15 = vld [vmem:[%s3018_s1 + $0x58] sm:$0xff] (!%p290_p9)  ;;  %v598_v17 = vld [vmem:[%s3020_s3] sm:$0xff] (!%p290_p9)  ;;  %s323_s27 = scalar_lea.vmem (!%p290_p9), [#allocation2], %s2286_s23  ;;  %s2974_s16 = scalar_lea.hbm (!%p290_p9), %s3026_s9, %s2321_s26 }
  0x12   : > { %370 = vxpose.xlu0.b32.cont [2/4] (short) (narrow) (!%p290_p9), %v330_v2, 8  ;;  %v343_v14 = vld [vmem:[%s3018_s1 + $0x70] sm:$0xff] (!%p290_p9)  ;;  %v344_v16 = vld [vmem:[%s3018_s1 + $0x78] sm:$0xff] (!%p290_p9)  ;;  %v602_v18 = vld [vmem:[%s3020_s3 + $0x20] sm:$0xff] (!%p290_p9)  ;;  %s2223_s28 = sshll.u32 (!%p290_p9), %s323_s27, 4  ;;  %s2210_s17 = scalar_lea.sflag (!%p290_p9), [#allocation3], %s321_s22  ;;  %s2976_s28 = int_to_ptr.vmem [resolvable:$true] %s2223_s28 }
  0x13   : > { %402 = vxpose.xlu1.b32.cont [2/4] (short) (narrow) (!%p290_p9), %v334_v3, 8  ;;  %v599_v19 = vld [vmem:[%s3020_s3 + $0x8] sm:$0xff] (!%p290_p9)  ;;  %v600_v21 = vld [vmem:[%s3020_s3 + $0x10] sm:$0xff] (!%p290_p9)  ;;  %v601_v23 = vld [vmem:[%s3020_s3 + $0x18] sm:$0xff] (!%p290_p9)  ;;  %v2572_v3 = vmov (!%p290_p9), 0.0   ;;  %s2507_s21 = scalar_lea.vmem (!%p290_p9), %s2976_s28, 128 }
  0x14   : > { %v603_v20 = vld [vmem:[%s3020_s3 + $0x28] sm:$0xff] (!%p290_p9)  ;;  %v604_v22 = vld [vmem:[%s3020_s3 + $0x30] sm:$0xff] (!%p290_p9)  ;;  %v605_v24 = vld [vmem:[%s3020_s3 + $0x38] sm:$0xff] (!%p290_p9)  ;;  %p2508_p11 = scmp.ne.s32.totalorder (!%p290_p9), %s2976_s28, %s2507_s21 }
  0x15   : > { %s325_s29 = scalar_select %p324_p10, %s2646_s13, 1  ;;  %v606_v25 = vld [vmem:[%s3020_s3 + $0x40] sm:$0xff]  ;;  %v607_v27 = vld [vmem:[%s3020_s3 + $0x48] sm:$0xff]  ;;  %v608_v29 = vld [vmem:[%s3020_s3 + $0x50] sm:$0xff] }
  0x16   : > { %371 = vxpose.xlu0.b32.cont [3/4] (short) (narrow) %v331_v4, 8  ;;  %v610_v26 = vld [vmem:[%s3020_s3 + $0x60] sm:$0xff]  ;;  %v611_v28 = vld [vmem:[%s3020_s3 + $0x68] sm:$0xff]  ;;  %v612_v30 = vld [vmem:[%s3020_s3 + $0x70] sm:$0xff]  ;;  %p2509_p12 = pnand %p2508_p11, %p2663_p5  ;;  %s2574_s13 = smov [#allocation2]  }
  0x17   : > { %s2287_s14 = sshll.u32 %s325_s29, 3  ;;  %403 = vxpose.xlu1.b32.cont [3/4] (short) (narrow) %v335_v5, 8  ;;  %v609_v31 = vld [vmem:[%s3020_s3 + $0x58] sm:$0xff]  ;;  %v346_v33 = vld [vmem:[%s3019_s2 + $0x8] sm:$0xff]  ;;  %v347_v35 = vld [vmem:[%s3019_s2 + $0x10] sm:$0xff]  ;;  %s2511_s23 = sshll.u32 %s2574_s13, 4  ;;  %s2512_s23 = int_to_ptr.vmem [resolvable:$false] %s2511_s23 }
  0x18   : > { %s327_s25 = scalar_lea.vmem %s3017_s0, %s2287_s14  ;;  %v613_v32 = vld [vmem:[%s3020_s3 + $0x78] sm:$0xff]  ;;  %v345_v37 = vld [vmem:[%s3019_s2] sm:$0xff]  ;;  %v615_v39 = vld [vmem:[%s3021_s4 + $0x8] sm:$0xff]  ;;  %p2510_p13 = pneg %p2509_p12 }
  0x19   : > { %v2702_v8 = vld [vmem:[%s327_s25] sm:$0xff]  ;;  %v348_v36 = vld [vmem:[%s3019_s2 + $0x18] sm:$0xff]  ;;  %v616_v40 = vld [vmem:[%s3021_s4 + $0x10] sm:$0xff]  ;;  %s2513_s24 = scalar_lea.vmem %s2512_s23, 256  ;;  %p2514_p0 = scmp.lt.s32.totalorder %s2976_s28, %s2512_s23 }
  0x1a   : > { %2363 = vmatprep.subr.msk.mxu0 %vm497_vm0, %v2702_v8  ;;  %2371 = vmatprep.subr.msk.mxu1 %vm497_vm0, %v2702_v8  ;;  %v614_v38 = vld [vmem:[%s3021_s4] sm:$0xff]  ;;  %v617_v41 = vld [vmem:[%s3021_s4 + $0x18] sm:$0xff]  ;;  %v868_v45 = vld [vmem:[%s3022_s5 + $0x28] sm:$0xff]  ;;  %p2515_p1 = scmp.lt.s32.totalorder %s2513_s24, %s2507_s21 }
  0x1b   : > { %2364 = vmatpush3.xpose.msk.msra.mxu0 %vm497_vm0, %v2702_v8  ;;  %2372 = vmatpush3.xpose.msk.msra.mxu1 %vm497_vm0, %v2702_v8  ;;  %v867_v44 = vld [vmem:[%s3022_s5 + $0x20] sm:$0xff]  ;;  %v869_v49 = vld [vmem:[%s3022_s5 + $0x30] sm:$0xff]  ;;  %v864_v50 = vld [vmem:[%s3022_s5 + $0x8] sm:$0xff] }
  0x1c   : > { %372 = vxpose.xlu0.b32.end [4/4] (short) (narrow) %v332_v6, 8  ;;  %404 = vxpose.xlu1.b32.end [4/4] (short) (narrow) %v336_v7, 8  ;;  %v863_v48 = vld [vmem:[%s3022_s5] sm:$0xff]  ;;  %v870_v51 = vld [vmem:[%s3022_s5 + $0x38] sm:$0xff]  ;;  %v865_v52 = vld [vmem:[%s3022_s5 + $0x10] sm:$0xff]  ;;  %p2516_p2 = por %p2515_p1, %p2514_p0 }
  0x1d   : > { %2379 = vmatprep.subr.msk.mxu0 %vm497_vm0, %v2702_v8  ;;  %v871_v53 = vld [vmem:[%s3022_s5 + $0x40] sm:$0xff]  ;;  %v866_v54 = vld [vmem:[%s3022_s5 + $0x18] sm:$0xff]  ;;  %v872_v55 = vld [vmem:[%s3022_s5 + $0x48] sm:$0xff]  ;;  %2387 = vmatprep.subr.mxu1 %v2572_v3 }
  0x1e   : > { %v873_v58 = vld [vmem:[%s3022_s5 + $0x50] sm:$0xff]  ;;  %v874_v59 = vld [vmem:[%s3022_s5 + $0x58] sm:$0xff]  ;;  %v875_v62 = vld [vmem:[%s3022_s5 + $0x60] sm:$0xff]  ;;  %p2517_p3 = pnand %p2516_p2, %p2510_p13 }
  0x1f   : > { %v876_v63 = vld [vmem:[%s3022_s5 + $0x68] sm:$0xff]  ;;  %v877_v0 = vld [vmem:[%s3022_s5 + $0x70] sm:$0xff]  ;;  %v878_v1 = vld [vmem:[%s3022_s5 + $0x78] sm:$0xff] }
  0x20   : > { %433 = vxpose.xlu0.b32.start [1/4] (short) (narrow) %v337_v9, 8  ;;  %465 = vxpose.xlu1.b32.start [1/4] (short) (narrow) %v341_v10, 8 }
  0x24   : > { %434 = vxpose.xlu0.b32.cont [2/4] (short) (narrow) %v338_v11, 8  ;;  %466 = vxpose.xlu1.b32.cont [2/4] (short) (narrow) %v342_v12, 8 }
  0x28   : > { %435 = vxpose.xlu0.b32.cont [3/4] (short) (narrow) %v339_v13, 8  ;;  %467 = vxpose.xlu1.b32.cont [3/4] (short) (narrow) %v343_v14, 8 }
  0x2c   : > { %436 = vxpose.xlu0.b32.end [4/4] (short) (narrow) %v340_v15, 8  ;;  %468 = vxpose.xlu1.b32.end [4/4] (short) (narrow) %v344_v16, 8 }
  0x30   : > { %638 = vxpose.xlu0.b32.start [1/4] (short) (narrow) %v598_v17, 8  ;;  %670 = vxpose.xlu1.b32.start [1/4] (short) (narrow) %v602_v18, 8 }
  0x34   : > { %639 = vxpose.xlu0.b32.cont [2/4] (short) (narrow) %v599_v19, 8  ;;  %671 = vxpose.xlu1.b32.cont [2/4] (short) (narrow) %v603_v20, 8 }
  0x38   : > { %640 = vxpose.xlu0.b32.cont [3/4] (short) (narrow) %v600_v21, 8  ;;  %672 = vxpose.xlu1.b32.cont [3/4] (short) (narrow) %v604_v22, 8 }
  0x3c   : > { %641 = vxpose.xlu0.b32.end [4/4] (short) (narrow) %v601_v23, 8  ;;  %673 = vxpose.xlu1.b32.end [4/4] (short) (narrow) %v605_v24, 8 }
  0x40   : > { %702 = vxpose.xlu0.b32.start [1/4] (short) (narrow) %v606_v25, 8  ;;  %734 = vxpose.xlu1.b32.start [1/4] (short) (narrow) %v610_v26, 8 }
  0x44   : > { %703 = vxpose.xlu0.b32.cont [2/4] (short) (narrow) %v607_v27, 8  ;;  %735 = vxpose.xlu1.b32.cont [2/4] (short) (narrow) %v611_v28, 8 }
  0x48   : > { %704 = vxpose.xlu0.b32.cont [3/4] (short) (narrow) %v608_v29, 8  ;;  %736 = vxpose.xlu1.b32.cont [3/4] (short) (narrow) %v612_v30, 8 }
  0x4c   : > { %705 = vxpose.xlu0.b32.end [4/4] (short) (narrow) %v609_v31, 8  ;;  %737 = vxpose.xlu1.b32.end [4/4] (short) (narrow) %v613_v32, 8 }
  0x6a   : > { %2490 = vset.pattern.permute.xlu1 %v2571_v34 }
  0x6b   : > { %356 = vperm.xlu1 %2490, %v346_v33  }
  0x6f   : > { %361 = vperm.xlu1 %2490, %v347_v35  }
  0x73   : > { %366 = vperm.xlu1 %2490, %v348_v36  }
  0x75   : > { %2489 = vset.pattern.permute.xlu0 %v2571_v34 }
  0x76   : > { %351 = vperm.xlu0 %2489, %v345_v37  }
  0x77   : > { %620 = vperm.xlu1 %2490, %v614_v38  }
  0x7a   : > { %625 = vperm.xlu0 %2489, %v615_v39  }
  0x7b   : > { %630 = vperm.xlu1 %2490, %v616_v40  }
  0x7e   : > { %635 = vperm.xlu0 %2489, %v617_v41  }
  0x90   : > { %v385_v42 = vpop.trf.xlu0  ;;  %v417_v43 = vpop.trf.xlu1 }
  0x91   : > { %2365 = vmatprep.mubr.msk.f32.mxu0 %vm497_vm0, %v385_v42 }
  0x92   : > { %2366 = vmatmul.mubr.msk.f32.vlgmr.msra.gmra.mrb[0].mxu0 %vm497_vm0, %v417_v43 }
  0x93   : > { %2380 = vmatpush3.xpose.msk.msra.mxu0 %vm497_vm0, %v2702_v8 }
  0x94   : > { %2397 = vmatprep.subr.mxu0 %v2572_v3 }
  0x9c   : > { %935 = vxpose.xlu0.b32.start [1/4] (short) (narrow) %v867_v44, 8 }
  0xa0   : > { %v449_v46 = vpop.trf.xlu0  ;;  %v481_v47 = vpop.trf.xlu1  ;;  %936 = vxpose.xlu0.b32.cont [2/4] (short) (narrow) %v868_v45, 8 }
  0xa1   : > { %2368 = vmatprep.mubr.msk.f32.mxu0 %vm497_vm0, %v449_v46 }
  0xa2   : > { %2369 = vmatmul.mubr.msk.f32.gmra.mrb[2].mxu0 %vm497_vm0, %v481_v47 }
  0xa4   : > { %903 = vxpose.xlu1.b32.start [1/4] (short) (narrow) %v863_v48, 8  ;;  %937 = vxpose.xlu0.b32.cont [3/4] (short) (narrow) %v869_v49, 8 }
  0xa8   : > { %904 = vxpose.xlu1.b32.cont [2/4] (short) (narrow) %v864_v50, 8  ;;  %938 = vxpose.xlu0.b32.end [4/4] (short) (narrow) %v870_v51, 8  ;;  %v879_v51 = vld [vmem:[%s3023_s6] sm:$0xff] }
  0xac   : > { %905 = vxpose.xlu1.b32.cont [3/4] (short) (narrow) %v865_v52, 8  ;;  %967 = vxpose.xlu0.b32.start [1/4] (short) (narrow) %v871_v53, 8  ;;  %v880_v52 = vld [vmem:[%s3023_s6 + $0x8] sm:$0xff] }
  0xb0   : > { %v654_v56 = vpop.trf.xlu0  ;;  %v686_v57 = vpop.trf.xlu1  ;;  %906 = vxpose.xlu1.b32.end [4/4] (short) (narrow) %v866_v54, 8  ;;  %968 = vxpose.xlu0.b32.cont [2/4] (short) (narrow) %v872_v55, 8 }
  0xb1   : > { %2373 = vmatprep.mubr.msk.f32.mxu1 %vm497_vm0, %v654_v56 }
  0xb2   : > { %2374 = vmatmul.mubr.msk.f32.vlgmr.msra.gmra.mrb[0].mxu1 %vm497_vm0, %v686_v57 }
  0xb4   : > { %969 = vxpose.xlu0.b32.cont [3/4] (short) (narrow) %v873_v58, 8  ;;  %999 = vxpose.xlu1.b32.start [1/4] (short) (narrow) %v875_v62, 8 }
  0xb8   : > { %970 = vxpose.xlu0.b32.end [4/4] (short) (narrow) %v874_v59, 8  ;;  %1000 = vxpose.xlu1.b32.cont [2/4] (short) (narrow) %v876_v63, 8 }
  0xbc   : > { %1001 = vxpose.xlu1.b32.cont [3/4] (short) (narrow) %v877_v0, 8 }
  0xc0   : > { %v718_v60 = vpop.trf.xlu0  ;;  %v750_v61 = vpop.trf.xlu1  ;;  %1002 = vxpose.xlu1.b32.end [4/4] (short) (narrow) %v878_v1, 8 }
  0xc1   : > { %2376 = vmatprep.mubr.msk.f32.mxu1 %vm497_vm0, %v718_v60 }
  0xc2   : > { %2377 = vmatmul.mubr.msk.f32.gmra.mrb[2].mxu1 %vm497_vm0, %v750_v61 }
  0xc3   : > { %2389 = vmatprep.mubr.msk.f32.mxu1 %vm2573_vm1, %v2572_v3 }
  0xea   : > { %v357_v2 = vpop.permute.xlu1 %356 }
  0xee   : > { %v362_v4 = vpop.permute.xlu1 %361 }
  0xf2   : > { %v367_v6 = vpop.permute.xlu1 %366 }
  0xf5   : > { %v352_v5 = vpop.permute.xlu0 %351 }
  0xf6   : > { %v621_v8 = vpop.permute.xlu1 %620 }
  0xf9   : > { %v626_v7 = vpop.permute.xlu0 %625 }
  0xfa   : > { %v631_v10 = vpop.permute.xlu1 %630 }
  0xfd   : > { %v636_v9 = vpop.permute.xlu0 %635 }
 0x11c   : > { %v951_v11 = vpop.trf.xlu0 }
 0x124   : > { %v919_v12 = vpop.trf.xlu1 }
 0x125   : > { %2381 = vmatprep.mubr.msk.f32.mxu0 %vm497_vm0, %v919_v12 }
 0x126   : > { %2382 = vmatmul.mubr.msk.f32.vlgmr.msra.gmra.mrb[4].mxu0 %vm497_vm0, %v951_v11 }
 0x12c   : > { %v983_v13 = vpop.trf.xlu0 }
 0x12d   : > { %2384 = vmatprep.mubr.msk.f32.mxu0 %vm497_vm0, %v983_v13 }
 0x134   : > { %v1015_v18 = vpop.trf.xlu1 }
 0x135   : > { %2385 = vmatmul.mubr.msk.f32.gmra.mrb[6].mxu0 %vm497_vm0, %v1015_v18 }
 0x136   : > { %2399 = vmatprep.mubr.msk.f32.mxu0 %vm2573_vm1, %v2572_v3 }
 0x165   : > { %v2367_v14 = vpop.f32.mrb[0].mxu0 }
 0x166   : > { %v579_v15 = vpop.f32.mrb[1].mxu0  ;;  %v585_v17 = vadd.f32 %v2367_v14, %v357_v2  ;;  %v881_v14 = vld [vmem:[%s3023_s6 + $0x10] sm:$0xff] }
 0x167   : > { %v580_v16 = vadd.f32 %v579_v15, %v352_v5  ;;  %v882_v15 = vld [vmem:[%s3023_s6 + $0x18] sm:$0xff] }
 0x169   : > { %1128 = vxpose.xlu0.b32.start.end [1/1] (short) (narrow) %v580_v16, 8 }
 0x16d   : > { %1234 = vxpose.xlu0.b32.start.end [1/1] (short) (narrow) %v585_v17, 8 }
 0x175   : > { %v2370_v19 = vpop.f32.mrb[2].mxu0 }
 0x176   : > { %v595_v20 = vadd.f32 %v2370_v19, %v367_v6  ;;  %v589_v21 = vpop.f32.mrb[3].mxu0 }
 0x177   : > { %v590_v22 = vadd.f32 %v589_v21, %v362_v4 }
 0x178   : > { %1444 = vxpose.xlu1.b32.start.end [1/1] (short) (narrow) %v595_v20, 8 }
 0x179   : > { %1339 = vxpose.xlu0.b32.start.end [1/1] (short) (narrow) %v590_v22, 8 }
 0x185   : > { %v2375_v23 = vpop.f32.mrb[0].mxu1 }
 0x186   : > { %v844_v24 = vpop.f32.mrb[1].mxu1  ;;  %v850_v29 = vadd.f32 %v2375_v23, %v626_v7 }
 0x187   : > { %v845_v25 = vadd.f32 %v844_v24, %v621_v8 }
 0x189   : > { %2388 = vmatpush3.msra.mxu1 %v845_v25 }
 0x18a   : > { %2392 = vmatprep.subr.mxu1 %v2572_v3 }
 0x195   : > { %v2378_v26 = vpop.f32.mrb[2].mxu1 }
 0x196   : > { %v854_v27 = vpop.f32.mrb[3].mxu1  ;;  %v860_v31 = vadd.f32 %v2378_v26, %v636_v9 }
 0x197   : > { %v855_v28 = vadd.f32 %v854_v27, %v631_v10 }
 0x199   : > { %2398 = vmatpush3.msra.mxu0 %v855_v28 }
 0x19a   : > { %2407 = vmatprep.subr.mxu0 %v2572_v3 }
 0x1e9   : > { %v1144_v30 = vpop.trf.xlu0 }
 0x1ea   : > { %2390 = vmatmul.mubr.msk.f32.vlgmr.msra.gmra.mrb[4].mxu1 %vm1160_vm2, %v1144_v30 }
 0x1eb   : > { %2393 = vmatpush3.msra.mxu1 %v850_v29  ;;  %2394 = vmatprep.mubr.msk.f32.mxu1 %vm2573_vm1, %v2572_v3 }
 0x1ec   : > { %2402 = vmatprep.subr.mxu1 %v2572_v3 }
 0x1ed   : > { %v1250_v32 = vpop.trf.xlu0 }
 0x1ee   : > { %2395 = vmatmul.mubr.msk.f32.vlgmr.msra.gmra.mrb[6].mxu1 %vm1160_vm2, %v1250_v32  ;;  %v1897_v32 = vld [vmem:[%s3024_s7] sm:$0xff] }
 0x1ef   : > { %2403 = vmatpush3.msra.mxu1 %v860_v31  ;;  %2404 = vmatprep.mubr.msk.f32.mxu1 %vm2573_vm1, %v2572_v3 }
 0x1f0   : > { %2412 = vmatprep.subr.mxu1 %v2572_v3 }
 0x1f8   : > { %v1460_v33 = vpop.trf.xlu1 }
 0x1f9   : > { %v1355_v34 = vpop.trf.xlu0  ;;  %2405 = vmatmul.mubr.msk.f32.vlgmr.msra.gmra.mrb[8].mxu1 %vm1160_vm2, %v1460_v33  ;;  %v2383_v35 = vpop.f32.mrb[4].mxu0  ;;  %v1898_v33 = vld [vmem:[%s3024_s7 + $0x8] sm:$0xff] }
 0x1fa   : > { %2400 = vmatmul.mubr.msk.f32.vlgmr.msra.gmra.mrb[8].mxu0 %vm1160_vm2, %v1355_v34  ;;  %v1109_v36 = vpop.f32.mrb[5].mxu0  ;;  %2414 = vmatprep.mubr.msk.f32.mxu1 %vm2573_vm1, %v2572_v3  ;;  %v1899_v34 = vld [vmem:[%s3024_s7 + $0x10] sm:$0xff] }
 0x1fb   : > { %2409 = vmatprep.mubr.msk.f32.mxu0 %vm2573_vm1, %v2572_v3 }
 0x208   : > { %v2894_v37 = vpop.f32.mrb[6].mxu0 }
 0x209   : > { %v2896_v38 = vpop.f32.mrb[7].mxu0 }
 0x2bd   : > { %v1230_v39 = vpop.f32.mrb[4].mxu1 }
 0x2be   : > { %v1549_v40 = vsel %vm1160_vm2, %v1230_v39, -inf  ;;  %v2391_v41 = vpop.f32.mrb[5].mxu1 }
 0x2bf   : > { %1550 = vmax.xlane.f32.xlu0 %v1549_v40 }
 0x2c1   : > { %v1335_v42 = vpop.f32.mrb[6].mxu1 }
 0x2c2   : > { %v1552_v43 = vsel %vm1160_vm2, %v1335_v42, -inf  ;;  %v2396_v44 = vpop.f32.mrb[7].mxu1 }
 0x2c3   : > { %1553 = vmax.xlane.f32.xlu1 %v1552_v43 }
 0x2cc   : > { %v1545_v45 = vpop.f32.mrb[8].mxu1 }
 0x2cd   : > { %v1440_v46 = vpop.f32.mrb[8].mxu0  ;;  %v2406_v47 = vpop.f32.mrb[9].mxu1  ;;  %v1558_v50 = vsel %vm1160_vm2, %v1545_v45, -inf }
 0x2ce   : > { %v2401_v48 = vpop.f32.mrb[9].mxu0  ;;  %v1555_v49 = vsel %vm1160_vm2, %v1440_v46, -inf }
 0x2cf   : > { %1556 = vmax.xlane.f32.xlu1 %v1555_v49 }
 0x2d3   : > { %1559 = vmax.xlane.f32.xlu1 %v1558_v50 }
 0x2d5   : > { %885 = vperm.xlu0 %2489, %v879_v51  }
 0x2e4   : > { %890 = vperm.xlu1 %2490, %v880_v52  }
 0x34c   : > { %v1551_v53 = vpop.xlane.xlu0 %1550 }
 0x34d   : > { %v1561_v54 = vsub.f32 %v1230_v39, %v1551_v53 }
 0x34f   : > { %v1565_v55 = vmul.f32 1.442695, %v1561_v54 }
 0x350   : > { %v1554_v56 = vpop.xlane.xlu1 %1553 }
 0x351   : > { %2491 = vpow2.f32 %v1565_v55  ;;  %v1562_v57 = vsub.f32 %v1335_v42, %v1554_v56  ;;  %v2319_v56 = vld [vmem:[%s3025_s8] ss:$0 sm:$0xff] }
 0x353   : > { %v1567_v58 = vmul.f32 1.442695, %v1562_v57 }
 0x354   : > { %v886_v59 = vpop.permute.xlu0 %885 }
 0x355   : > { %2493 = vpow2.f32 %v1567_v58  ;;  %v1110_v60 = vadd.f32 %v1109_v36, %v886_v59 }
 0x357   : > { %2408 = vmatpush3.xpose.msk.msra.mxu0 %vm1160_vm2, %v1110_v60 }
 0x358   : > { %2417 = vmatprep.subr.mxu0 %v2572_v3 }
 0x35b   : > { %v2492_v61 = vpop.eup %2491 }
 0x35c   : > { %v1557_v62 = vpop.xlane.xlu1 %1556  ;;  %v1573_v63 = vsel %vm1160_vm2, %v2492_v61, 0.0 }
 0x35d   : > { %v1563_v0 = vsub.f32 %v1440_v46, %v1557_v62  ;;  %1574 = vadd.xlane.f32.xlu0 %v1573_v63 }
 0x35f   : > { %v2494_v1 = vpop.eup %2493  ;;  %v1569_v2 = vmul.f32 1.442695, %v1563_v0 }
 0x360   : > { %v1560_v4 = vpop.xlane.xlu1 %1559  ;;  %v1576_v5 = vsel %vm1160_vm2, %v2494_v1, 0.0 }
 0x361   : > { %2495 = vpow2.f32 %v1569_v2  ;;  %v1564_v6 = vsub.f32 %v1545_v45, %v1560_v4  ;;  %1577 = vadd.xlane.f32.xlu1 %v1576_v5 }
 0x363   : > { %v1571_v7 = vmul.f32 1.442695, %v1564_v6 }
 0x364   : > { %v891_v8 = vpop.permute.xlu1 %890 }
 0x365   : > { %2497 = vpow2.f32 %v1571_v7  ;;  %v1115_v9 = vadd.f32 %v2383_v35, %v891_v8 }
 0x367   : > { %2413 = vmatpush3.xpose.msk.msra.mxu1 %vm1160_vm2, %v1115_v9 }
 0x368   : > { %2422 = vmatprep.subr.mxu1 %v2572_v3 }
 0x36b   : > { %v2496_v10 = vpop.eup %2495 }
 0x36c   : > { %v1579_v11 = vsel %vm1160_vm2, %v2496_v10, 0.0 }
 0x36d   : > { %1580 = vadd.xlane.f32.xlu0 %v1579_v11 }
 0x36f   : > { %v2498_v12 = vpop.eup %2497 }
 0x370   : > { %v1582_v13 = vsel %vm1160_vm2, %v2498_v12, 0.0 }
 0x371   : > { %1583 = vadd.xlane.f32.xlu1 %v1582_v13 }
 0x382   : > { %895 = vperm.xlu1 %2490, %v881_v14  }
 0x383   : > { %900 = vperm.xlu0 %2489, %v882_v15  }
 0x3ea   : > { %v1575_v16 = vpop.xlane.xlu0 %1574 }
 0x3eb   : > { %2499 = vrcp.f32 %v1575_v16 }
 0x3ee   : > { %v1578_v17 = vpop.xlane.xlu1 %1577 }
 0x3ef   : > { %2501 = vrcp.f32 %v1578_v17 }
 0x3f5   : > { %v2500_v18 = vpop.eup %2499 }
 0x3f6   : > { %v1589_v19 = vmul.f32 %v2500_v18, %v2492_v61 }
 0x3f8   : > { %2410 = vmatmul.mubr.msk.f32.vlgmr.msra.gmra.mrb[10].mxu0 %vm1160_vm2, %v1589_v19 }
 0x3f9   : > { %v2502_v20 = vpop.eup %2501  ;;  %2419 = vmatprep.mubr.msk.f32.mxu0 %vm2573_vm1, %v2572_v3 }
 0x3fa   : > { %v1590_v21 = vmul.f32 %v2502_v20, %v2494_v1  ;;  %v1581_v22 = vpop.xlane.xlu0 %1580 }
 0x3fb   : > { %2503 = vrcp.f32 %v1581_v22 }
 0x3fc   : > { %2415 = vmatmul.mubr.msk.f32.vlgmr.msra.gmra.mrb[10].mxu1 %vm1160_vm2, %v1590_v21 }
 0x3fd   : > { %2424 = vmatprep.mubr.msk.f32.mxu1 %vm2573_vm1, %v2572_v3 }
 0x3fe   : > { %v1584_v23 = vpop.xlane.xlu1 %1583 }
 0x3ff   : > { %2505 = vrcp.f32 %v1584_v23 }
 0x402   : > { %v896_v24 = vpop.permute.xlu1 %895  ;;  %v901_v25 = vpop.permute.xlu0 %900 }
 0x403   : > { %v1120_v26 = vadd.f32 %v2896_v38, %v896_v24  ;;  %v1125_v27 = vadd.f32 %v2894_v37, %v901_v25  ;;  %v1900_v37 = vld [vmem:[%s3024_s7 + $0x18] sm:$0xff] }
 0x405   : > { %v2504_v28 = vpop.eup %2503  ;;  %2418 = vmatpush3.xpose.msk.msra.mxu0 %vm1160_vm2, %v1120_v26  ;;  %2423 = vmatpush3.xpose.msk.msra.mxu1 %vm1160_vm2, %v1125_v27 }
 0x406   : > { %v1591_v29 = vmul.f32 %v2504_v28, %v2496_v10  ;;  %2427 = vmatprep.subr.mxu0 %v2572_v3  ;;  %2432 = vmatprep.subr.mxu1 %v2572_v3 }
 0x408   : > { %2420 = vmatmul.mubr.msk.f32.vlgmr.msra.gmra.mrb[12].mxu0 %vm1160_vm2, %v1591_v29 }
 0x409   : > { %v2506_v30 = vpop.eup %2505  ;;  %2429 = vmatprep.mubr.msk.f32.mxu0 %vm2573_vm1, %v2572_v3  ;;  %2428 = vmatpush3.msra.mxu0 %v1897_v32 }
 0x40a   : > { %v1592_v31 = vmul.f32 %v2506_v30, %v2498_v12  ;;  %2437 = vmatprep.subr.mxu0 %v2572_v3 }
 0x40c   : > { %2425 = vmatmul.mubr.msk.f32.vlgmr.msra.gmra.mrb[12].mxu1 %vm1160_vm2, %v1592_v31 }
 0x40d   : > { %2434 = vmatprep.mubr.msk.f32.mxu1 %vm2573_vm1, %v2572_v3  ;;  %2433 = vmatpush3.msra.mxu1 %v1898_v33 }
 0x40e   : > { %2442 = vmatprep.subr.mxu1 %v2572_v3 }
 0x4cb   : > { %v1665_v35 = vpop.f32.mrb[10].mxu0 }
 0x4cc   : > { %v2411_v36 = vpop.f32.mrb[11].mxu0  ;;  %2430 = vmatmul.mubr.msk.f32.vlgmr.msra.gmra.mrb[14].mxu0 %vm1160_vm2, %v1665_v35 }
 0x4cd   : > { %2438 = vmatpush3.msra.mxu0 %v1899_v34  ;;  %2439 = vmatprep.mubr.msk.f32.mxu0 %vm2573_vm1, %v2572_v3 }
 0x4cf   : > { %v1741_v38 = vpop.f32.mrb[10].mxu1 }
 0x4d0   : > { %v2416_v39 = vpop.f32.mrb[11].mxu1  ;;  %2435 = vmatmul.mubr.msk.f32.vlgmr.msra.gmra.mrb[14].mxu1 %vm1160_vm2, %v1741_v38 }
 0x4d1   : > { %2443 = vmatpush3.msra.mxu1 %v1900_v37  ;;  %2444 = vmatprep.mubr.msk.f32.mxu1 %vm2573_vm1, %v2572_v3 }
 0x4db   : > { %v1817_v40 = vpop.f32.mrb[12].mxu0 }
 0x4dc   : > { %v2421_v41 = vpop.f32.mrb[13].mxu0  ;;  %2440 = vmatmul.mubr.msk.f32.vlgmr.msra.gmra.mrb[16].mxu0 %vm1160_vm2, %v1817_v40 }
 0x4df   : > { %v1893_v42 = vpop.f32.mrb[12].mxu1 }
 0x4e0   : > { %v2426_v43 = vpop.f32.mrb[13].mxu1  ;;  %2445 = vmatmul.mubr.msk.f32.vlgmr.msra.gmra.mrb[16].mxu1 %vm1160_vm2, %v1893_v42 }
 0x59f   : > { %v1970_v44 = vpop.f32.mrb[14].mxu0 }
 0x5a0   : > { %v2431_v45 = vpop.f32.mrb[15].mxu0  ;;  %v2193_v47 = vsel %vm497_vm0, %v1970_v44, 0.0 }
 0x5a3   : > { %v2043_v46 = vpop.f32.mrb[14].mxu1 }
 0x5a4   : > { %v2194_v48 = vsel %vm497_vm0, %v2043_v46, 0.0  ;;  %v2436_v49 = vpop.f32.mrb[15].mxu1 }
 0x5a5   : > { %v2195_v50 = vadd.f32 %v2194_v48, %v2193_v47 }
 0x5af   : > { %v2116_v3 = vpop.f32.mrb[16].mxu0 }
 0x5b0   : > { %v2196_v51 = vsel %vm497_vm0, %v2116_v3, 0.0  ;;  %v2441_v52 = vpop.f32.mrb[17].mxu0 }
 0x5b1   : > { %v2197_v53 = vadd.f32 %v2196_v51, %v2195_v50 }
 0x5b3   : > { %v2189_v54 = vpop.f32.mrb[16].mxu1 }
 0x5b4   : > { %v2198_v55 = vsel %vm497_vm0, %v2189_v54, 0.0  ;;  %v2446_v57 = vpop.f32.mrb[17].mxu1 }
 0x5b5   : > { %v2199_v58 = vadd.f32 %v2198_v55, %v2197_v53 }
 0x5b7   : > { %v2207_v59 = vadd.f32 %v2319_v56, %v2199_v58 }
 0x5b9   : > { %2208 = vst.msk [vmem:[%s323_s27] sm:$0xff] %vm497_vm0, %v2207_v59 }
 0x5ba   : > { %2520 = shalt.err (!%p2517_p3)
}
 0x5bb   : > { %s2521_s22 = scalar_lea.hbm %s2974_s16, 128  ;;  %s2525_s27 = scalar_lea.hbm %s3026_s9, 256 }
 0x5bc   : > { %p2522_p4 = scmp.ne.s32.totalorder %s2974_s16, %s2521_s22  ;;  %p2526_p9 = scmp.lt.u32.totalorder %s2974_s16, %s3026_s9 }
 0x5bd   : > { %p2527_p10 = scmp.lt.u32.totalorder %s2525_s27, %s2521_s22  ;;  %p2529_p12 = scmp.lt.u32.totalorder %s2521_s22, %s2974_s16 }
 0x5be   : > { %p2523_p7 = pnand %p2522_p4, %p2663_p5 }
 0x5bf   : > { %p2528_p11 = por %p2527_p10, %p2526_p9 }
 0x5c0   : > { %p2524_p8 = pneg %p2523_p7 }
 0x5c1   : > { %p2530_p13 = por %p2529_p12, %p2528_p11 }
 0x5c3   : > { %p2531_p0 = pnand %p2530_p13, %p2524_p8 }
 0x5c5   : > { %2534 = shalt.err (!%p2531_p0)
}
 0x5c6   : > { %2447 = dma.vmem_to_hbm [thread:$0]  (%p2663_p5), %s2976_s28, 128, %s2974_s16, %s2210_s17  }
 0x5c7 PF: > { %p2453_p1 = scmp.ge.s32.totalorder %s2569_s12, 2  ;;  %s2235_s21 = sand.u32 1, %s2557_s30  }
 0x5c8   : > { %s2236_s13 = scalar_lea.sflag [#allocation3], %s2235_s21 }
 0x5c9   : > { %p2450_p2 = pnand %p2453_p1, %p2667_p6 }
 0x5cb   : > { %2552 = dma.done.wait (!%p2450_p2), %s2236_s13, 128  }
 0x5cc   : > { %2554 = vsyncadd (!%p2450_p2), %s2236_s13, 4294967168  ;;  %p19_p3 = scmp.ge.s32.totalorder %s2650_s15, 4   ;;  %s3029_s30 = smov %s2561_s10 }
 0x5cd   : > { %s3030_s10 = smov %s2565_s11  ;;  %s3031_s11 = smov %s2661_s18 }
 0x5ce   : > { %s3032_s12 = smov %s2650_s15  ;;  %21 = sbr.rel (!%p19_p3) target bundleno = 3 (0x3), region = 91 }
 0x5d5   :  { %2241 = vsyncpa [#allocation3], 1 }
 0x5d6   :  { %2243 = vsyncpa [#allocation3 + $0x1], 1 }

</bundles_post_ra>
